<compile_context>
chip_gen: v5e
topology: v5e:2x2
jax: 0.10.0
libtpu: 0.0.40
codegen_flags: <defaults>
</compile_context>

<pallas_src>
import functools

import jax
import jax.numpy as jnp
from jax.experimental import pallas as pl
from jax.experimental.pallas import tpu as pltpu

HIDDEN = 256


def _round_up(x, m):
    return ((x + m - 1) // m) * m


def critic_kernel(x_ref, w1_ref, b1_ref, w2_ref, b2_ref, w3_ref, b3_ref, v_ref):
    # x arrives as raw f32 (TB, S); cast to bf16 feeding the MXU (f32 accum).
    x = x_ref[...].astype(jnp.bfloat16)
    # Layer 1: (TB, S)bf16 @ (S, 256)bf16 -> f32 ; bias + ReLU in f32.
    h1 = jnp.dot(x, w1_ref[...], preferred_element_type=jnp.float32)
    h1 = jnp.maximum(h1 + b1_ref[...], 0.0)
    # Layer 2: (TB, 256)bf16 @ (256, 256)bf16 -> f32 ; bias + ReLU in f32.
    h2 = jnp.dot(h1.astype(jnp.bfloat16), w2_ref[...],
                 preferred_element_type=jnp.float32)
    h2 = jnp.maximum(h2 + b2_ref[...], 0.0)
    # Layer 3 (out_features = 1): VPU multiply by the single real w3 row (f32)
    # + XLU lane-reduce -> (TB, 1). No zero-padded 128-wide MXU matmul / slab.
    v_ref[...] = jnp.sum(h2 * w3_ref[...], axis=-1, keepdims=True) + b3_ref[...]


def _critic_xla(state, p):
    """Small-batch fallback: identical math, fused by XLA (no Pallas launch)."""
    h1 = jnp.maximum(
        jnp.dot(state.astype(jnp.bfloat16), p["w1"],
                preferred_element_type=jnp.float32) + p["b1"], 0.0)
    h2 = jnp.maximum(
        jnp.dot(h1.astype(jnp.bfloat16), p["w2"],
                preferred_element_type=jnp.float32) + p["b2"], 0.0)
    return jnp.sum(h2 * p["w3"], axis=-1, keepdims=True) + p["b3"]


def _pick_tile(B, tb_max):
    """Largest tile that amortizes grid-step overhead while keeping >= 2 grid
    steps (feeds both v7x TensorCores); always a multiple of 16."""
    bp16 = _round_up(B, 16)
    tb = min(tb_max, max(256, _round_up((bp16 + 1) // 2, 16)))
    return min(tb, bp16)


@functools.partial(jax.jit, static_argnames=("tb_max", "min_pallas_batch"))
def critic_forward(state, params, *, tb_max=1024, min_pallas_batch=257):
    """state: (B, state_dim) f32; params: prepared (bf16-weight) dict.

    Returns (B, 1) f32, matching the PyTorch Critic.forward semantics.
    """
    B, S = state.shape
    if B < min_pallas_batch:
        # Single-grid-step regime: Pallas launch + padding overhead would
        # dominate a ~micro-FLOP problem; XLA's fused GEMM chain is optimal.
        return _critic_xla(state, params)

    w1, b1, w2, b2, w3, b3 = (params["w1"], params["b1"], params["w2"],
                              params["b2"], params["w3"], params["b3"])
    hidden = w1.shape[1]

    tb = _pick_tile(B, tb_max)
    bp = _round_up(B, tb)
    x = state
    if bp != B:  # pad batch to a tile multiple (rows are independent; sliced off)
        x = jnp.zeros((bp, S), state.dtype).at[:B].set(state)

    resident = lambda shape: pl.BlockSpec(shape, lambda i: (0, 0))

    out = pl.pallas_call(
        critic_kernel,
        out_shape=jax.ShapeDtypeStruct((bp, 1), jnp.float32),
        grid=(bp // tb,),
        in_specs=[
            pl.BlockSpec((tb, S), lambda i: (i, 0)),              # x tile (f32)
            resident((S, hidden)), resident((1, hidden)),         # w1, b1
            resident((hidden, hidden)), resident((1, hidden)),    # w2, b2
            resident((1, hidden)), resident((1, 1)),              # w3 row, b3
        ],
        out_specs=pl.BlockSpec((tb, 1), lambda i: (i, 0)),        # narrow output
        compiler_params=pltpu.CompilerParams(
            dimension_semantics=("parallel",),  # shard batch tiles on v7x's 2 TCs
            vmem_limit_bytes=32 << 20,
        ),
    )(x, w1, b1, w2, b2, w3, b3)

    return out if bp == B else out[:B]


def init_params(key, state_dim, hidden=HIDDEN):
    """PyTorch nn.Linear-style uniform(-1/sqrt(fan_in), +) init, stored (in, out)."""
    ks = jax.random.split(key, 6)

    def uniform(k, shape, fan_in):
        bound = 1.0 / jnp.sqrt(jnp.float32(fan_in))
        return jax.random.uniform(k, shape, jnp.float32, -bound, bound)

    return {
        "w1": uniform(ks[0], (state_dim, hidden), state_dim),
        "b1": uniform(ks[1], (1, hidden), state_dim),
        "w2": uniform(ks[2], (hidden, hidden), hidden),
        "b2": uniform(ks[3], (1, hidden), hidden),
        "w3": uniform(ks[4], (hidden, 1), hidden),
        "b3": uniform(ks[5], (1, 1), hidden),
    }


def prepare_params(p):
    """bf16 MXU weights for layers 1-2, f32 biases; layer 3 stays f32 as a
    (1, 256) row because it runs on the VPU (no 128-lane padding needed)."""
    return {
        "w1": p["w1"].astype(jnp.bfloat16),   # (S, 256)
        "b1": p["b1"],                        # (1, 256) f32
        "w2": p["w2"].astype(jnp.bfloat16),   # (256, 256)
        "b2": p["b2"],                        # (1, 256) f32
        "w3": jnp.transpose(p["w3"]),         # (1, 256) f32
        "b3": p["b3"],                        # (1, 1)   f32
    }


def critic_ref(state, p):
    """Pure-JAX f32 reference with the original (unprepared) params."""
    h1 = jnp.maximum(state @ p["w1"] + p["b1"], 0.0)
    h2 = jnp.maximum(h1 @ p["w2"] + p["b2"], 0.0)
    return h2 @ p["w3"] + p["b3"]


if __name__ == "__main__":
    key = jax.random.PRNGKey(0)
    k_param, k_state = jax.random.split(key)

    state_dim = 16
    params_f32 = init_params(k_param, state_dim)
    params = prepare_params(params_f32)

    # Large-enough batch to exercise the Pallas path (2 grid steps of 256 rows).
    batch = 512
    state = jax.random.normal(k_state, (batch, state_dim), jnp.float32)
    v = critic_forward(state, params)
    jax.block_until_ready(v)

    v_ref = critic_ref(state, params_f32)
    assert v.shape == (batch, 1)
    # bf16 operands with f32 accumulation -> relaxed tolerance vs f32 reference.
    assert jnp.allclose(v, v_ref, atol=1e-1, rtol=5e-2), (
        f"max abs err {jnp.max(jnp.abs(v - v_ref))}")

    # Tiny batch goes through the fused-XLA fallback (same math, same params).
    state_small = state[:8]
    v_small = critic_forward(state_small, params)
    jax.block_until_ready(v_small)
    assert v_small.shape == (8, 1)
    assert jnp.allclose(v_small, v_ref[:8], atol=1e-1, rtol=5e-2)

    print("KERNEL_OK")
</pallas_src>

<mosaic_0001>
module attributes {stable_mosaic.version = 11 : i64} {
  func.func @critic_kernel(%arg0: i32, %arg1: memref<256x16xf32, #tpu.memory_space<vmem>>, %arg2: memref<16x256xbf16, #tpu.memory_space<vmem>>, %arg3: memref<1x256xf32, #tpu.memory_space<vmem>>, %arg4: memref<256x256xbf16, #tpu.memory_space<vmem>>, %arg5: memref<1x256xf32, #tpu.memory_space<vmem>>, %arg6: memref<1x256xf32, #tpu.memory_space<vmem>>, %arg7: memref<1x1xf32, #tpu.memory_space<vmem>>, %arg8: memref<256x1xf32, #tpu.memory_space<vmem>>) attributes {dimension_semantics = [#tpu.dimension_semantics<parallel>], iteration_bounds = array<i64: 2>, scalar_prefetch = 0 : i64, scratch_operands = 0 : i64, tpu.core_type = #tpu.core_type<tc>, window_params = [{transform_indices = @transform_0, window_bounds = array<i64: 256, 16>}, {pipeline_mode = #tpu.pipeline_mode<synchronous>, transform_indices = @transform_1, window_bounds = array<i64: 16, 256>}, {pipeline_mode = #tpu.pipeline_mode<synchronous>, transform_indices = @transform_2, window_bounds = array<i64: 1, 256>}, {pipeline_mode = #tpu.pipeline_mode<synchronous>, transform_indices = @transform_3, window_bounds = array<i64: 256, 256>}, {pipeline_mode = #tpu.pipeline_mode<synchronous>, transform_indices = @transform_4, window_bounds = array<i64: 1, 256>}, {pipeline_mode = #tpu.pipeline_mode<synchronous>, transform_indices = @transform_5, window_bounds = array<i64: 1, 256>}, {pipeline_mode = #tpu.pipeline_mode<synchronous>, transform_indices = @transform_6, window_bounds = array<i64: 1, 1>}, {transform_indices = @transform_7, window_bounds = array<i64: 256, 1>}]} {
    %c0 = arith.constant 0 : index
    %c0_0 = arith.constant 0 : index
    %0 = vector.load %arg1[%c0, %c0_0] : memref<256x16xf32, #tpu.memory_space<vmem>>, vector<256x16xf32>
    %1 = arith.truncf %0 : vector<256x16xf32> to vector<256x16xbf16>
    %c0_1 = arith.constant 0 : index
    %c0_2 = arith.constant 0 : index
    %2 = vector.load %arg2[%c0_1, %c0_2] : memref<16x256xbf16, #tpu.memory_space<vmem>>, vector<16x256xbf16>
    %cst = arith.constant dense<0.000000e+00> : vector<256x256xf32>
    %3 = tpu.matmul %1, %2, %cst {dimension_numbers = #tpu.dot_dimension_numbers<[1], [0], [0], [1], [0, 0, 1, 1], [], []>} : vector<256x16xbf16>, vector<16x256xbf16>, vector<256x256xf32> -> vector<256x256xf32>
    %c0_3 = arith.constant 0 : index
    %c0_4 = arith.constant 0 : index
    %4 = vector.load %arg3[%c0_3, %c0_4] : memref<1x256xf32, #tpu.memory_space<vmem>>, vector<1x256xf32>
    %5 = vector.broadcast %4 : vector<1x256xf32> to vector<256x256xf32>
    %6 = arith.addf %3, %5 : vector<256x256xf32>
    %cst_5 = arith.constant 0.000000e+00 : f32
    %7 = vector.broadcast %cst_5 : f32 to vector<256x256xf32>
    %8 = arith.maximumf %6, %7 : vector<256x256xf32>
    %9 = arith.truncf %8 : vector<256x256xf32> to vector<256x256xbf16>
    %c0_6 = arith.constant 0 : index
    %c0_7 = arith.constant 0 : index
    %10 = vector.load %arg4[%c0_6, %c0_7] : memref<256x256xbf16, #tpu.memory_space<vmem>>, vector<256x256xbf16>
    %cst_8 = arith.constant dense<0.000000e+00> : vector<256x256xf32>
    %11 = tpu.matmul %9, %10, %cst_8 {dimension_numbers = #tpu.dot_dimension_numbers<[1], [0], [0], [1], [0, 0, 1, 1], [], []>} : vector<256x256xbf16>, vector<256x256xbf16>, vector<256x256xf32> -> vector<256x256xf32>
    %c0_9 = arith.constant 0 : index
    %c0_10 = arith.constant 0 : index
    %12 = vector.load %arg5[%c0_9, %c0_10] : memref<1x256xf32, #tpu.memory_space<vmem>>, vector<1x256xf32>
    %13 = vector.broadcast %12 : vector<1x256xf32> to vector<256x256xf32>
    %14 = arith.addf %11, %13 : vector<256x256xf32>
    %cst_11 = arith.constant 0.000000e+00 : f32
    %15 = vector.broadcast %cst_11 : f32 to vector<256x256xf32>
    %16 = arith.maximumf %14, %15 : vector<256x256xf32>
    %c0_12 = arith.constant 0 : index
    %c0_13 = arith.constant 0 : index
    %17 = vector.load %arg6[%c0_12, %c0_13] : memref<1x256xf32, #tpu.memory_space<vmem>>, vector<1x256xf32>
    %18 = vector.broadcast %17 : vector<1x256xf32> to vector<256x256xf32>
    %19 = arith.mulf %16, %18 : vector<256x256xf32>
    %cst_14 = arith.constant dense<0.000000e+00> : vector<256xf32>
    %20 = vector.multi_reduction <add>, %19, %cst_14 [1] : vector<256x256xf32> to vector<256xf32>
    %21 = vector.shape_cast %20 : vector<256xf32> to vector<256x1xf32>
    %c0_15 = arith.constant 0 : index
    %c0_16 = arith.constant 0 : index
    %22 = vector.load %arg7[%c0_15, %c0_16] : memref<1x1xf32, #tpu.memory_space<vmem>>, vector<1x1xf32>
    %23 = vector.broadcast %22 : vector<1x1xf32> to vector<256x1xf32>
    %24 = arith.addf %21, %23 : vector<256x1xf32>
    %c0_17 = arith.constant 0 : index
    %c0_18 = arith.constant 0 : index
    %25 = vector.load %arg8[%c0_17, %c0_18] : memref<256x1xf32, #tpu.memory_space<vmem>>, vector<256x1xf32>
    tpu.vector_store %arg8[%c0_17, %c0_18], %24 {strides = array<i32>} : memref<256x1xf32, #tpu.memory_space<vmem>>, vector<256x1xf32>,
    return
  }
  func.func @transform_0(%arg0: i32) -> (i32, i32) {
    %c0_i32 = arith.constant 0 : i32
    %c0_i32_0 = arith.constant 0 : i32
    return %arg0, %c0_i32 : i32, i32
  }
  func.func @transform_1(%arg0: i32) -> (i32, i32) {
    %c0_i32 = arith.constant 0 : i32
    %c0_i32_0 = arith.constant 0 : i32
    %c0_i32_1 = arith.constant 0 : i32
    return %c0_i32, %c0_i32_0 : i32, i32
  }
  func.func @transform_2(%arg0: i32) -> (i32, i32) {
    %c0_i32 = arith.constant 0 : i32
    %c0_i32_0 = arith.constant 0 : i32
    %c0_i32_1 = arith.constant 0 : i32
    return %c0_i32, %c0_i32_0 : i32, i32
  }
  func.func @transform_3(%arg0: i32) -> (i32, i32) {
    %c0_i32 = arith.constant 0 : i32
    %c0_i32_0 = arith.constant 0 : i32
    %c0_i32_1 = arith.constant 0 : i32
    return %c0_i32, %c0_i32_0 : i32, i32
  }
  func.func @transform_4(%arg0: i32) -> (i32, i32) {
    %c0_i32 = arith.constant 0 : i32
    %c0_i32_0 = arith.constant 0 : i32
    %c0_i32_1 = arith.constant 0 : i32
    return %c0_i32, %c0_i32_0 : i32, i32
  }
  func.func @transform_5(%arg0: i32) -> (i32, i32) {
    %c0_i32 = arith.constant 0 : i32
    %c0_i32_0 = arith.constant 0 : i32
    %c0_i32_1 = arith.constant 0 : i32
    return %c0_i32, %c0_i32_0 : i32, i32
  }
  func.func @transform_6(%arg0: i32) -> (i32, i32) {
    %c0_i32 = arith.constant 0 : i32
    %c0_i32_0 = arith.constant 0 : i32
    %c0_i32_1 = arith.constant 0 : i32
    return %c0_i32, %c0_i32_0 : i32, i32
  }
  func.func @transform_7(%arg0: i32) -> (i32, i32) {
    %c0_i32 = arith.constant 0 : i32
    %c0_i32_0 = arith.constant 0 : i32
    return %arg0, %c0_i32 : i32, i32
  }
}

</mosaic_0001>

<bundles_post_ra>
// kernel: critic_forward.1
= control target key start
LH: loop header
LB: loop body
LE: loop exit
PB: predicated region body
PF: predicated region fallthrough
CT: control target
= control target key end

     0   :  { %s1866_s26 = smov 0   ;;  %s2571_s0 = inlined_call_operand.vmem [shape: f32[512,16], index: 0, kind: input, shape index: {}]   ;;  %s2572_s1 = inlined_call_operand.vmem [shape: bf16[16,256], index: 1, kind: input, shape index: {}]   ;;  %s2573_s2 = inlined_call_operand.vmem [shape: f32[1,256], index: 2, kind: input, shape index: {}]   ;;  %s2574_s3 = inlined_call_operand.vmem [shape: bf16[256,256], index: 3, kind: input, shape index: {}]   ;;  %s2575_s4 = inlined_call_operand.vmem [shape: f32[1,256], index: 4, kind: input, shape index: {}]   ;;  %s2576_s5 = inlined_call_operand.vmem [shape: f32[1,256], index: 5, kind: input, shape index: {}]   ;;  %s2577_s6 = inlined_call_operand.<no memory space> [shape: f32[1,1], index: 6, kind: input, shape index: {}]   ;;  %s2578_s7 = inlined_call_operand.vmem [shape: f32[512,1], index: 7, kind: output, shape index: {}]  }
   0x1   :  { %v12_v0 = vstv %s2577_s6 }
   0x2   :  { %13 = vst [vmem:[#allocation2] sm:$0x1] %v12_v0 }
   0x3 LB: > { %s1583_s27 = sadd.s32 4294967295, %s1821_s26   ;;  %p1587_p0 = scmp.ge.s32.totalorder %s1821_s26, 1  ;;  %s1821_s26 = sphi %s1866_s26, %s19_s26  }
   0x4   : > { %p240_p1 = scmp.lt.s32.totalorder %s1821_s26, 3 }
   0x6   : > { %p241_p2 = pnand %p1587_p0, %p240_p1 }
   0x7   : > { %s1588_s12 = sshll.u32 (!%p241_p2), %s1583_s27, 5 }
   0x8   : > { %244 = sbr.rel (%p241_p2) target bundleno = 686 (0x2ae), region = 48  ;;  %p273_p3 = scmp.lt.s32.totalorder (!%p241_p2), %s1588_s12, 63 }
   0xd   : > { %v1594_v1 = vld [vmem:[%s2572_s1] sm:$0xf]  ;;  %v1763_v2 = vld [vmem:[%s2572_s1 + $0x4] sm:$0xf0]  ;;  %v1762_v3 = vld [vmem:[%s2572_s1 + $0x4] sm:$0xf] }
   0xe   : > { %v1595_v4 = vor.u32 %v1763_v2, %v1594_v1  ;;  %v1596_v5 = vld [vmem:[%s2572_s1 + $0x8] sm:$0xf0]  ;;  %v1690_v6 = vld [vmem:[%s2574_s3 + $0x70] sm:$0xf]  ;;  %v1779_v8 = vld [vmem:[%s2574_s3 + $0x74] sm:$0xf0] }
   0xf   : > { %v1599_v7 = vor.u32 %v1762_v3, %v1596_v5  ;;  %v1754_v9 = vld [vmem:[%s2574_s3 + $0xf0] sm:$0xf]  ;;  %v1691_v10 = vor.u32 %v1779_v8, %v1690_v6  ;;  %v1795_v11 = vld [vmem:[%s2574_s3 + $0xf4] sm:$0xf0]  ;;  %s2580_s12 = smov (!%p273_p3, %s1588_s12), 63  ;;  %vm351_vm0 = vcmask 130048  }
  0x10   : > { %407 = vmatpush.bf16.msra.mxu0 %v1595_v4  ;;  %1796 = vmatpush.bf16.msra.mxu2 %v1595_v4  ;;  %v1755_v12 = vor.u32 %v1795_v11, %v1754_v9  ;;  %s1589_s21 = sshll.u32 %s2580_s12, 3  ;;  %v1778_v22 = vld [vmem:[%s2574_s3 + $0x74] sm:$0xf]  ;;  %v1692_v23 = vld [vmem:[%s2574_s3 + $0x78] sm:$0xf0]  ;;  %vm1494_vm1 = vcmask 7168  }
  0x11   : > { %496 = vmatpush.bf16.msra.mxu1 %v1599_v7  ;;  %1797 = vmatpush.bf16.msra.mxu3 %v1599_v7  ;;  %s1906_s24 = scalar_lea.vmem %s2571_s0, %s1589_s21  ;;  %v1926_v24 = vor.u32 %v1778_v22, %v1692_v23  ;;  %v1794_v25 = vld [vmem:[%s2574_s3 + $0xf4] sm:$0xf]  ;;  %v1756_v26 = vld [vmem:[%s2574_s3 + $0xf8] sm:$0xf0]  ;;  %v1682_v27 = vld [vmem:[%s2574_s3 + $0x60] sm:$0xf]  ;;  %s2404_s9 = scalar_lea.vmem %s2578_s7, %s1589_s21 }
  0x12   : > { %v285_v13 = vld [vmem:[%s1906_s24] sm:$0xff]  ;;  %v286_v14 = vld [vmem:[%s1906_s24 + $0x8] sm:$0xff]  ;;  %v303_v19 = vld [vmem:[%s1906_s24 + $0x90] sm:$0xff]  ;;  %v1759_v29 = vor.u32 %v1794_v25, %v1756_v26 }
  0x13   : > { %v301_v15 = vld [vmem:[%s1906_s24 + $0x80] sm:$0xff]  ;;  %v317_v16 = vpack.c.bf16 %v286_v14, %v285_v13  ;;  %v302_v17 = vld [vmem:[%s1906_s24 + $0x88] sm:$0xff]  ;;  %v304_v20 = vld [vmem:[%s1906_s24 + $0x98] sm:$0xff] }
  0x14   : > { %872 = vmatpush.bf16.msrb.mxu2 %v1691_v10  ;;  %v1912_v18 = vpack.c.bf16 %v302_v17, %v301_v15  ;;  %v326_v21 = vpack.c.bf16 %v304_v20, %v303_v19  ;;  %v1777_v28 = vld [vmem:[%s2574_s3 + $0x64] sm:$0xf0]  ;;  %1050 = vmatpush.bf16.msrb.mxu0 %v1926_v24  ;;  %v1746_v31 = vld [vmem:[%s2574_s3 + $0xe0] sm:$0xf]  ;;  %v287_v34 = vld [vmem:[%s1906_s24 + $0x10] sm:$0xff] }
  0x15   : > { %961 = vmatpush.bf16.msrb.mxu3 %v1755_v12  ;;  %1600 = vmatmul.msk.bf16.vlgmr.msra.gmra.mxu0 %vm351_vm0, %v317_v16  ;;  %v1683_v30 = vor.u32 %v1777_v28, %v1682_v27  ;;  %v1793_v32 = vld [vmem:[%s2574_s3 + $0xe4] sm:$0xf0]  ;;  %v288_v35 = vld [vmem:[%s1906_s24 + $0x18] sm:$0xff]  ;;  %v305_v36 = vld [vmem:[%s1906_s24 + $0xa0] sm:$0xff] }
  0x16   : > { %1616 = vmatmul.msk.bf16.vlgmr.msra.gmra.mxu1 %vm351_vm0, %v317_v16  ;;  %1624 = vmatmul.msk.bf16.vlgmr.msra.gmra.mxu3 %vm351_vm0, %v1912_v18  ;;  %v1747_v33 = vor.u32 %v1793_v32, %v1746_v31  ;;  %v306_v37 = vld [vmem:[%s1906_s24 + $0xa8] sm:$0xff]  ;;  %v318_v38 = vpack.c.bf16 %v288_v35, %v287_v34  ;;  %v1776_v40 = vld [vmem:[%s2574_s3 + $0x64] sm:$0xf]  ;;  %v1674_v46 = vld [vmem:[%s2574_s3 + $0x50] sm:$0xf] }
  0x17   : > { %1609 = vmatmul.msk.bf16.vlgmr.msra.gmra.mxu2 %vm351_vm0, %v326_v21  ;;  %1139 = vmatpush.bf16.msrb.mxu1 %v1759_v29  ;;  %v327_v39 = vpack.c.bf16 %v306_v37, %v305_v36  ;;  %v1684_v41 = vld [vmem:[%s2574_s3 + $0x68] sm:$0xf0]  ;;  %v1792_v42 = vld [vmem:[%s2574_s3 + $0xe4] sm:$0xf]  ;;  %v1775_v47 = vld [vmem:[%s2574_s3 + $0x54] sm:$0xf0] }
  0x18   : > { %873 = vmatpush.bf16.msrb.mxu2 %v1683_v30  ;;  %v1748_v43 = vld [vmem:[%s2574_s3 + $0xe8] sm:$0xf0]  ;;  %v1968_v44 = vor.u32 %v1776_v40, %v1684_v41  ;;  %v1738_v48 = vld [vmem:[%s2574_s3 + $0xd0] sm:$0xf]  ;;  %v1675_v49 = vor.u32 %v1775_v47, %v1674_v46  ;;  %v1791_v50 = vld [vmem:[%s2574_s3 + $0xd4] sm:$0xf0] }
  0x19   : > { %962 = vmatpush.bf16.msrb.mxu3 %v1747_v33  ;;  %v1751_v45 = vor.u32 %v1792_v42, %v1748_v43  ;;  %v1739_v51 = vor.u32 %v1791_v50, %v1738_v48  ;;  %v289_v52 = vld [vmem:[%s1906_s24 + $0x20] sm:$0xff]  ;;  %v290_v53 = vld [vmem:[%s1906_s24 + $0x28] sm:$0xff]  ;;  %v307_v54 = vld [vmem:[%s1906_s24 + $0xb0] sm:$0xff] }
  0x1a   : > { %1051 = vmatpush.bf16.msrb.mxu0 %v1968_v44  ;;  %v308_v55 = vld [vmem:[%s1906_s24 + $0xb8] sm:$0xff]  ;;  %v319_v56 = vpack.c.bf16 %v290_v53, %v289_v52  ;;  %v1790_v58 = vld [vmem:[%s2574_s3 + $0xd4] sm:$0xf]  ;;  %v1666_v60 = vld [vmem:[%s2574_s3 + $0x40] sm:$0xf] }
  0x1b   : > { %1140 = vmatpush.bf16.msrb.mxu1 %v1751_v45  ;;  %v328_v57 = vpack.c.bf16 %v308_v55, %v307_v54  ;;  %v1740_v59 = vld [vmem:[%s2574_s3 + $0xd8] sm:$0xf0]  ;;  %v1773_v61 = vld [vmem:[%s2574_s3 + $0x44] sm:$0xf0]  ;;  %v1774_v0 = vld [vmem:[%s2574_s3 + $0x54] sm:$0xf] }
  0x1c   : > { %874 = vmatpush.bf16.msrb.mxu2 %v1675_v49  ;;  %v1743_v62 = vor.u32 %v1790_v58, %v1740_v59  ;;  %v1667_v63 = vor.u32 %v1773_v61, %v1666_v60  ;;  %v1676_v1 = vld [vmem:[%s2574_s3 + $0x58] sm:$0xf0]  ;;  %v1730_v2 = vld [vmem:[%s2574_s3 + $0xc0] sm:$0xf]  ;;  %v1789_v4 = vld [vmem:[%s2574_s3 + $0xc4] sm:$0xf0] }
  0x1d   : > { %963 = vmatpush.bf16.msrb.mxu3 %v1739_v51  ;;  %v2012_v3 = vor.u32 %v1774_v0, %v1676_v1  ;;  %v1731_v5 = vor.u32 %v1789_v4, %v1730_v2  ;;  %v291_v6 = vld [vmem:[%s1906_s24 + $0x30] sm:$0xff]  ;;  %v292_v7 = vld [vmem:[%s1906_s24 + $0x38] sm:$0xff]  ;;  %v309_v8 = vld [vmem:[%s1906_s24 + $0xc0] sm:$0xff] }
  0x1e   : > { %v310_v9 = vld [vmem:[%s1906_s24 + $0xc8] sm:$0xff]  ;;  %v320_v10 = vpack.c.bf16 %v292_v7, %v291_v6  ;;  %v1658_v12 = vld [vmem:[%s2574_s3 + $0x30] sm:$0xf]  ;;  %v1771_v13 = vld [vmem:[%s2574_s3 + $0x34] sm:$0xf0] }
  0x1f   : > { %1141 = vmatpush.bf16.msrb.mxu1 %v1743_v62  ;;  %1052 = vmatpush.bf16.msrb.mxu0 %v2012_v3  ;;  %v329_v11 = vpack.c.bf16 %v310_v9, %v309_v8  ;;  %v1788_v14 = vld [vmem:[%s2574_s3 + $0xc4] sm:$0xf]  ;;  %v1732_v15 = vld [vmem:[%s2574_s3 + $0xc8] sm:$0xf0]  ;;  %v1659_v16 = vor.u32 %v1771_v13, %v1658_v12  ;;  %v1787_v23 = vld [vmem:[%s2574_s3 + $0xb4] sm:$0xf0] }
  0x20   : > { %875 = vmatpush.bf16.msrb.mxu2 %v1667_v63  ;;  %v1735_v17 = vor.u32 %v1788_v14, %v1732_v15  ;;  %v1772_v19 = vld [vmem:[%s2574_s3 + $0x44] sm:$0xf]  ;;  %v1668_v20 = vld [vmem:[%s2574_s3 + $0x48] sm:$0xf0]  ;;  %v311_v28 = vld [vmem:[%s1906_s24 + $0xd0] sm:$0xff] }
  0x21   : > { %964 = vmatpush.bf16.msrb.mxu3 %v1731_v5  ;;  %v2047_v22 = vor.u32 %v1772_v19, %v1668_v20  ;;  %v293_v26 = vld [vmem:[%s1906_s24 + $0x40] sm:$0xff]  ;;  %v294_v27 = vld [vmem:[%s1906_s24 + $0x48] sm:$0xff]  ;;  %v312_v29 = vld [vmem:[%s1906_s24 + $0xd8] sm:$0xff] }
  0x22   : > { %v321_v30 = vpack.c.bf16 %v294_v27, %v293_v26  ;;  %v330_v31 = vpack.c.bf16 %v312_v29, %v311_v28  ;;  %v1650_v32 = vld [vmem:[%s2574_s3 + $0x20] sm:$0xf]  ;;  %v1769_v33 = vld [vmem:[%s2574_s3 + $0x24] sm:$0xf0]  ;;  %v1786_v35 = vld [vmem:[%s2574_s3 + $0xb4] sm:$0xf] }
  0x23   : > { %1142 = vmatpush.bf16.msrb.mxu1 %v1735_v17  ;;  %1053 = vmatpush.bf16.msrb.mxu0 %v2047_v22  ;;  %v1651_v34 = vor.u32 %v1769_v33, %v1650_v32  ;;  %v1724_v36 = vld [vmem:[%s2574_s3 + $0xb8] sm:$0xf0]  ;;  %v1714_v40 = vld [vmem:[%s2574_s3 + $0xa0] sm:$0xf]  ;;  %v1785_v42 = vld [vmem:[%s2574_s3 + $0xa4] sm:$0xf0] }
  0x24   : > { %876 = vmatpush.bf16.msrb.mxu2 %v1659_v16  ;;  %v1727_v37 = vor.u32 %v1786_v35, %v1724_v36  ;;  %v1715_v43 = vor.u32 %v1785_v42, %v1714_v40  ;;  %v295_v45 = vld [vmem:[%s1906_s24 + $0x50] sm:$0xff]  ;;  %v296_v46 = vld [vmem:[%s1906_s24 + $0x58] sm:$0xff]  ;;  %v313_v47 = vld [vmem:[%s1906_s24 + $0xe0] sm:$0xff] }
  0x25   : > { %1601 = vmatmul.msk.bf16.gmra.mxu0 %vm351_vm0, %v318_v38  ;;  %v314_v48 = vld [vmem:[%s1906_s24 + $0xe8] sm:$0xff]  ;;  %v322_v49 = vpack.c.bf16 %v296_v46, %v295_v45  ;;  %v1642_v51 = vld [vmem:[%s2574_s3 + $0x10] sm:$0xf]  ;;  %v1767_v52 = vld [vmem:[%s2574_s3 + $0x14] sm:$0xf0] }
  0x26   : > { %1617 = vmatmul.msk.bf16.gmra.mxu1 %vm351_vm0, %v318_v38  ;;  %1625 = vmatmul.msk.bf16.gmra.mxu3 %vm351_vm0, %v326_v21  ;;  %v1722_v21 = vld [vmem:[%s2574_s3 + $0xb0] sm:$0xf]  ;;  %v1770_v38 = vld [vmem:[%s2574_s3 + $0x34] sm:$0xf]  ;;  %v331_v50 = vpack.c.bf16 %v314_v48, %v313_v47  ;;  %v1643_v53 = vor.u32 %v1767_v52, %v1642_v51  ;;  %v1784_v54 = vld [vmem:[%s2574_s3 + $0xa4] sm:$0xf] }
  0x27   : > { %1610 = vmatmul.msk.bf16.gmra.mxu2 %vm351_vm0, %v327_v39  ;;  %v1723_v25 = vor.u32 %v1787_v23, %v1722_v21  ;;  %1143 = vmatpush.bf16.msrb.mxu1 %v1727_v37  ;;  %v1716_v55 = vld [vmem:[%s2574_s3 + $0xa8] sm:$0xf0]  ;;  %v297_v60 = vld [vmem:[%s1906_s24 + $0x60] sm:$0xff]  ;;  %v315_v62 = vld [vmem:[%s1906_s24 + $0xf0] sm:$0xff] }
  0x28   : > { %877 = vmatpush.bf16.msrb.mxu2 %v1651_v34  ;;  %v1652_v58 = vld [vmem:[%s2574_s3 + $0x28] sm:$0xf0]  ;;  %v316_v63 = vld [vmem:[%s1906_s24 + $0xf8] sm:$0xff]  ;;  %v1634_v2 = vld [vmem:[%s2574_s3] sm:$0xf] }
  0x29   : > { %965 = vmatpush.bf16.msrb.mxu3 %v1723_v25  ;;  %v298_v61 = vld [vmem:[%s1906_s24 + $0x68] sm:$0xff]  ;;  %v332_v1 = vpack.c.bf16 %v316_v63, %v315_v62  ;;  %v1706_v6 = vld [vmem:[%s2574_s3 + $0x90] sm:$0xf]  ;;  %v1783_v7 = vld [vmem:[%s2574_s3 + $0x94] sm:$0xf0] }
  0x2a   : > { %v323_v0 = vpack.c.bf16 %v298_v61, %v297_v60  ;;  %v1765_v4 = vld [vmem:[%s2574_s3 + $0x4] sm:$0xf0]  ;;  %v1782_v8 = vld [vmem:[%s2574_s3 + $0x94] sm:$0xf]  ;;  %v1707_v9 = vor.u32 %v1783_v7, %v1706_v6  ;;  %v1698_v12 = vld [vmem:[%s2574_s3 + $0x80] sm:$0xf] }
  0x2b   : > { %v1635_v5 = vor.u32 %v1765_v4, %v1634_v2  ;;  %v1781_v13 = vld [vmem:[%s2574_s3 + $0x84] sm:$0xf0]  ;;  %v1766_v14 = vld [vmem:[%s2574_s3 + $0x14] sm:$0xf]  ;;  %v1644_v16 = vld [vmem:[%s2574_s3 + $0x18] sm:$0xf0] }
  0x2c   : > { %878 = vmatpush.bf16.msrb.mxu2 %v1643_v53  ;;  %v1699_v15 = vor.u32 %v1781_v13, %v1698_v12  ;;  %v1700_v17 = vld [vmem:[%s2574_s3 + $0x88] sm:$0xf0]  ;;  %v1647_v19 = vor.u32 %v1766_v14, %v1644_v16  ;;  %v299_v21 = vld [vmem:[%s1906_s24 + $0x70] sm:$0xff]  ;;  %v300_v23 = vld [vmem:[%s1906_s24 + $0x78] sm:$0xff] }
  0x2d   : > { %966 = vmatpush.bf16.msrb.mxu3 %v1715_v43  ;;  %v1764_v25 = vld [vmem:[%s2574_s3 + $0x4] sm:$0xf]  ;;  %v1636_v26 = vld [vmem:[%s2574_s3 + $0x8] sm:$0xf0]  ;;  %v324_v27 = vpack.c.bf16 %v300_v23, %v299_v21 }
  0x2e   : > { %v1639_v28 = vor.u32 %v1764_v25, %v1636_v26 }
  0x30   : > { %879 = vmatpush.bf16.msrb.mxu2 %v1635_v5 }
  0x31   : > { %967 = vmatpush.bf16.msrb.mxu3 %v1707_v9 }
  0x34   : > { %1798 = vmatpush.bf16.msra.mxu2 %v1926_v24  ;;  %v1780_v24 = vld [vmem:[%s2574_s3 + $0x84] sm:$0xf] }
  0x35   : > { %1602 = vmatmul.msk.bf16.gmra.mxu0 %vm351_vm0, %v319_v56  ;;  %v1703_v20 = vor.u32 %v1780_v24, %v1700_v17  ;;  %968 = vmatpush.bf16.msrb.mxu3 %v1699_v15 }
  0x36   : > { %1618 = vmatmul.msk.bf16.gmra.mxu1 %vm351_vm0, %v319_v56  ;;  %1626 = vmatmul.msk.bf16.gmra.mxu3 %vm351_vm0, %v327_v39  ;;  %v1660_v39 = vld [vmem:[%s2574_s3 + $0x38] sm:$0xf0]  ;;  %v1719_v56 = vor.u32 %v1784_v54, %v1716_v55 }
  0x37   : > { %1611 = vmatmul.msk.bf16.gmra.mxu2 %vm351_vm0, %v328_v57  ;;  %v2082_v41 = vor.u32 %v1770_v38, %v1660_v39 }
  0x38   : > { %1144 = vmatpush.bf16.msrb.mxu1 %v1719_v56  ;;  %1799 = vmatpush.bf16.msra.mxu2 %v1968_v44  ;;  %v335_v44 = vld [vmem:[%s2573_s2] sm:$0x3] }
  0x39   : > { %1054 = vmatpush.bf16.msrb.mxu0 %v2082_v41 }
  0x3c   : > { %1800 = vmatpush.bf16.msra.mxu2 %v2012_v3  ;;  %v2177_v3 = vperm.slane %v335_v44, 1 }
  0x40   : > { %1801 = vmatpush.bf16.msra.mxu2 %v2047_v22 }
  0x44   : > { %1802 = vmatpush.bf16.msra.mxu2 %v2082_v41 }
  0x45   : > { %1603 = vmatmul.msk.bf16.gmra.mxu0 %vm351_vm0, %v320_v10 }
  0x46   : > { %1619 = vmatmul.msk.bf16.gmra.mxu1 %vm351_vm0, %v320_v10  ;;  %1627 = vmatmul.msk.bf16.gmra.mxu3 %vm351_vm0, %v328_v57  ;;  %v1768_v57 = vld [vmem:[%s2574_s3 + $0x24] sm:$0xf]  ;;  %v1708_v10 = vld [vmem:[%s2574_s3 + $0x98] sm:$0xf0] }
  0x47   : > { %1612 = vmatmul.msk.bf16.gmra.mxu2 %vm351_vm0, %v329_v11  ;;  %v1655_v59 = vor.u32 %v1768_v57, %v1652_v58 }
  0x49   : > { %1055 = vmatpush.bf16.msrb.mxu0 %v1655_v59  ;;  %1803 = vmatpush.bf16.msra.mxu2 %v1655_v59 }
  0x4d   : > { %1056 = vmatpush.bf16.msrb.mxu0 %v1647_v19  ;;  %1804 = vmatpush.bf16.msra.mxu2 %v1647_v19 }
  0x51   : > { %1057 = vmatpush.bf16.msrb.mxu0 %v1639_v28  ;;  %1805 = vmatpush.bf16.msra.mxu2 %v1639_v28 }
  0x55   : > { %1604 = vmatmul.msk.bf16.gmra.mxu0 %vm351_vm0, %v321_v30 }
  0x56   : > { %1620 = vmatmul.msk.bf16.gmra.mxu1 %vm351_vm0, %v321_v30  ;;  %1628 = vmatmul.msk.bf16.gmra.mxu3 %vm351_vm0, %v329_v11  ;;  %v1711_v11 = vor.u32 %v1782_v8, %v1708_v10 }
  0x57   : > { %1613 = vmatmul.msk.bf16.gmra.mxu2 %vm351_vm0, %v330_v31 }
  0x58   : > { %1145 = vmatpush.bf16.msrb.mxu1 %v1711_v11 }
  0x5c   : > { %1146 = vmatpush.bf16.msrb.mxu1 %v1703_v20 }
  0x65   : > { %1605 = vmatmul.msk.bf16.gmra.mxu0 %vm351_vm0, %v322_v49 }
  0x66   : > { %1621 = vmatmul.msk.bf16.gmra.mxu1 %vm351_vm0, %v322_v49  ;;  %1629 = vmatmul.msk.bf16.gmra.mxu3 %vm351_vm0, %v330_v31  ;;  %v2179_v31 = vperm.slane %v335_v44, 0 }
  0x67   : > { %1614 = vmatmul.msk.bf16.gmra.mxu2 %vm351_vm0, %v331_v50 }
  0x75   : > { %1606 = vmatmul.msk.bf16.gmra.mxu0 %vm351_vm0, %v323_v0 }
  0x76   : > { %1622 = vmatmul.msk.bf16.gmra.mxu1 %vm351_vm0, %v323_v0  ;;  %1630 = vmatmul.msk.bf16.gmra.mxu3 %vm351_vm0, %v331_v50 }
  0x77   : > { %1615 = vmatmul.msk.bf16.gmra.mxu2 %vm351_vm0, %v332_v1 }
  0x85   : > { %1607 = vmatmul.msk.bf16.gmra.mxu0 %vm351_vm0, %v324_v27 }
  0x86   : > { %1623 = vmatmul.msk.bf16.gmra.mxu1 %vm351_vm0, %v324_v27  ;;  %1631 = vmatmul.msk.bf16.gmra.mxu3 %vm351_vm0, %v332_v1 }
  0x92   : > { %v409_v29 = vpop.f32.mrf.mxu0 }
  0x93   : > { %v498_v30 = vpop.f32.mrf.mxu1  ;;  %v410_v32 = vadd.f32 %v409_v29, %v2179_v31 }
  0x94   : > { %v499_v22 = vadd.f32 %v498_v30, %v2177_v3 }
  0x95   : > { %1608 = vmatmul.msk.bf16.gmra.mxu0 %vm351_vm0, %v1912_v18  ;;  %v578_v40 = vmax.f32 %v410_v32, 0.0 }
  0x96   : > { %v579_v36 = vmax.f32 %v499_v22, 0.0 }
  0x99   : > { %v538_v33 = vpop.f32.mrf.mxu3 }
  0x9a   : > { %v411_v34 = vpop.f32.mrf.mxu0  ;;  %v2187_v39 = vpop.f32.mrf.mxu2  ;;  %v539_v18 = vadd.f32 %v538_v33, %v2177_v3 }
  0x9b   : > { %v500_v35 = vpop.f32.mrf.mxu1  ;;  %v412_v37 = vadd.f32 %v411_v34, %v2179_v31 }
  0x9c   : > { %v501_v38 = vadd.f32 %v500_v35, %v2177_v3  ;;  %v611_v49 = vmax.f32 %v539_v18, 0.0 }
  0x9d   : > { %v580_v41 = vmax.f32 %v412_v37, 0.0 }
  0x9e   : > { %v581_v42 = vmax.f32 %v501_v38, 0.0 }
  0x9f   : > { %v642_v43 = vpack.c.bf16 %v580_v41, %v578_v40 }
  0xa0   : > { %v643_v45 = vpack.c.bf16 %v581_v42, %v579_v36 }
  0xa1   : > { %880 = vmatmul.bf16.vlgmr.msrb.gmra.mxu2 %v642_v43  ;;  %v540_v46 = vpop.f32.mrf.mxu3 }
  0xa2   : > { %969 = vmatmul.bf16.vlgmr.msrb.gmra.mxu3 %v643_v45  ;;  %1147 = vmatmul.bf16.vlgmr.msrb.gmra.mxu1 %v643_v45  ;;  %v414_v47 = vpop.f32.mrf.mxu0  ;;  %v541_v50 = vadd.f32 %v540_v46, %v2177_v3  ;;  %v2191_v51 = vpop.f32.mrf.mxu2 }
  0xa3   : > { %v503_v48 = vpop.f32.mrf.mxu1  ;;  %v415_v55 = vadd.f32 %v414_v47, %v2179_v31 }
  0xa4   : > { %v613_v52 = vmax.f32 %v541_v50, 0.0  ;;  %v504_v54 = vadd.f32 %v503_v48, %v2177_v3 }
  0xa5   : > { %1058 = vmatmul.bf16.vlgmr.msrb.gmra.mxu0 %v642_v43  ;;  %v582_v62 = vmax.f32 %v415_v55, 0.0 }
  0xa6   : > { %v2193_v53 = vpack.c.bf16 %v613_v52, %v611_v49  ;;  %v583_v59 = vmax.f32 %v504_v54, 0.0 }
  0xa9   : > { %v543_v56 = vpop.f32.mrf.mxu3 }
  0xaa   : > { %v416_v57 = vpop.f32.mrf.mxu0  ;;  %v2199_v1 = vpop.f32.mrf.mxu2  ;;  %v544_v2 = vadd.f32 %v543_v56, %v2177_v3 }
  0xab   : > { %v505_v58 = vpop.f32.mrf.mxu1  ;;  %v417_v60 = vadd.f32 %v416_v57, %v2179_v31 }
  0xac   : > { %v506_v61 = vadd.f32 %v505_v58, %v2177_v3  ;;  %v615_v9 = vmax.f32 %v544_v2, 0.0 }
  0xad   : > { %v584_v63 = vmax.f32 %v417_v60, 0.0 }
  0xae   : > { %v585_v0 = vmax.f32 %v506_v61, 0.0 }
  0xaf   : > { %v644_v4 = vpack.c.bf16 %v584_v63, %v582_v62 }
  0xb0   : > { %v645_v5 = vpack.c.bf16 %v585_v0, %v583_v59 }
  0xb1   : > { %885 = vmatmul.bf16.gmra.mxu2 %v644_v4  ;;  %v545_v6 = vpop.f32.mrf.mxu3 }
  0xb2   : > { %974 = vmatmul.bf16.gmra.mxu3 %v645_v5  ;;  %1152 = vmatmul.bf16.gmra.mxu1 %v645_v5  ;;  %v419_v7 = vpop.f32.mrf.mxu0  ;;  %v546_v10 = vadd.f32 %v545_v6, %v2177_v3  ;;  %v2206_v14 = vpop.f32.mrf.mxu2 }
  0xb3   : > { %v508_v8 = vpop.f32.mrf.mxu1  ;;  %v420_v15 = vadd.f32 %v419_v7, %v2179_v31 }
  0xb4   : > { %v617_v11 = vmax.f32 %v546_v10, 0.0  ;;  %v509_v13 = vadd.f32 %v508_v8, %v2177_v3 }
  0xb5   : > { %1063 = vmatmul.bf16.gmra.mxu0 %v644_v4  ;;  %v586_v23 = vmax.f32 %v420_v15, 0.0 }
  0xb6   : > { %v2203_v12 = vpack.c.bf16 %v617_v11, %v615_v9  ;;  %v587_v19 = vmax.f32 %v509_v13, 0.0 }
  0xb9   : > { %v548_v16 = vpop.f32.mrf.mxu3 }
  0xba   : > { %v421_v24 = vpop.f32.mrf.mxu0  ;;  %v549_v27 = vadd.f32 %v548_v16, %v2177_v3  ;;  %v2212_v29 = vpop.f32.mrf.mxu2 }
  0xbb   : > { %v510_v17 = vpop.f32.mrf.mxu1  ;;  %v422_v20 = vadd.f32 %v421_v24, %v2179_v31 }
  0xbc   : > { %v511_v21 = vadd.f32 %v510_v17, %v2177_v3  ;;  %v619_v33 = vmax.f32 %v549_v27, 0.0 }
  0xbd   : > { %v588_v25 = vmax.f32 %v422_v20, 0.0 }
  0xbe   : > { %v589_v26 = vmax.f32 %v511_v21, 0.0 }
  0xbf   : > { %v646_v28 = vpack.c.bf16 %v588_v25, %v586_v23 }
  0xc0   : > { %v647_v44 = vpack.c.bf16 %v589_v26, %v587_v19 }
  0xc1   : > { %890 = vmatmul.bf16.gmra.mxu2 %v646_v28  ;;  %v550_v30 = vpop.f32.mrf.mxu3 }
  0xc2   : > { %979 = vmatmul.bf16.gmra.mxu3 %v647_v44  ;;  %1157 = vmatmul.bf16.gmra.mxu1 %v647_v44  ;;  %v424_v22 = vpop.f32.mrf.mxu0  ;;  %v551_v34 = vadd.f32 %v550_v30, %v2177_v3  ;;  %v2221_v46 = vpop.f32.mrf.mxu2 }
  0xc3   : > { %v513_v32 = vpop.f32.mrf.mxu1  ;;  %v425_v38 = vadd.f32 %v424_v22, %v2179_v31 }
  0xc4   : > { %v621_v35 = vmax.f32 %v551_v34, 0.0  ;;  %v514_v37 = vadd.f32 %v513_v32, %v2177_v3 }
  0xc5   : > { %1068 = vmatmul.bf16.gmra.mxu0 %v646_v28  ;;  %v590_v47 = vmax.f32 %v425_v38, 0.0 }
  0xc6   : > { %v2215_v36 = vpack.c.bf16 %v621_v35, %v619_v33  ;;  %v591_v18 = vmax.f32 %v514_v37, 0.0 }
  0xc9   : > { %v553_v40 = vpop.f32.mrf.mxu3 }
  0xca   : > { %v426_v41 = vpop.f32.mrf.mxu0  ;;  %v554_v50 = vadd.f32 %v553_v40, %v2177_v3  ;;  %v2225_v61 = vpop.f32.mrf.mxu2 }
  0xcb   : > { %v515_v42 = vpop.f32.mrf.mxu1  ;;  %v427_v43 = vadd.f32 %v426_v41, %v2179_v31 }
  0xcc   : > { %v516_v45 = vadd.f32 %v515_v42, %v2177_v3  ;;  %v623_v58 = vmax.f32 %v554_v50, 0.0 }
  0xcd   : > { %v592_v48 = vmax.f32 %v427_v43, 0.0 }
  0xce   : > { %v593_v49 = vmax.f32 %v516_v45, 0.0 }
  0xcf   : > { %v648_v52 = vpack.c.bf16 %v592_v48, %v590_v47 }
  0xd0   : > { %v649_v54 = vpack.c.bf16 %v593_v49, %v591_v18 }
  0xd1   : > { %895 = vmatmul.bf16.gmra.mxu2 %v648_v52  ;;  %v555_v55 = vpop.f32.mrf.mxu3 }
  0xd2   : > { %984 = vmatmul.bf16.gmra.mxu3 %v649_v54  ;;  %1162 = vmatmul.bf16.gmra.mxu1 %v649_v54  ;;  %v429_v56 = vpop.f32.mrf.mxu0  ;;  %v556_v59 = vadd.f32 %v555_v55, %v2177_v3  ;;  %v2234_v24 = vpop.f32.mrf.mxu2 }
  0xd3   : > { %v518_v57 = vpop.f32.mrf.mxu1  ;;  %v430_v0 = vadd.f32 %v429_v56, %v2179_v31 }
  0xd4   : > { %v625_v60 = vmax.f32 %v556_v59, 0.0  ;;  %v519_v63 = vadd.f32 %v518_v57, %v2177_v3 }
  0xd5   : > { %1073 = vmatmul.bf16.gmra.mxu0 %v648_v52  ;;  %v594_v9 = vmax.f32 %v430_v0, 0.0 }
  0xd6   : > { %v2227_v62 = vpack.c.bf16 %v625_v60, %v623_v58  ;;  %v595_v6 = vmax.f32 %v519_v63, 0.0 }
  0xd9   : > { %v558_v2 = vpop.f32.mrf.mxu3 }
  0xda   : > { %v431_v4 = vpop.f32.mrf.mxu0  ;;  %v559_v13 = vadd.f32 %v558_v2, %v2177_v3  ;;  %v2241_v44 = vpop.f32.mrf.mxu2 }
  0xdb   : > { %v520_v5 = vpop.f32.mrf.mxu1  ;;  %v432_v7 = vadd.f32 %v431_v4, %v2179_v31 }
  0xdc   : > { %v521_v8 = vadd.f32 %v520_v5, %v2177_v3  ;;  %v627_v21 = vmax.f32 %v559_v13, 0.0 }
  0xdd   : > { %v596_v10 = vmax.f32 %v432_v7, 0.0 }
  0xde   : > { %v597_v11 = vmax.f32 %v521_v8, 0.0 }
  0xdf   : > { %v650_v15 = vpack.c.bf16 %v596_v10, %v594_v9 }
  0xe0   : > { %v651_v16 = vpack.c.bf16 %v597_v11, %v595_v6 }
  0xe1   : > { %900 = vmatmul.bf16.gmra.mxu2 %v650_v15  ;;  %v560_v17 = vpop.f32.mrf.mxu3 }
  0xe2   : > { %989 = vmatmul.bf16.gmra.mxu3 %v651_v16  ;;  %1167 = vmatmul.bf16.gmra.mxu1 %v651_v16  ;;  %v434_v19 = vpop.f32.mrf.mxu0  ;;  %v561_v23 = vadd.f32 %v560_v17, %v2177_v3  ;;  %v2247_v50 = vpop.f32.mrf.mxu2 }
  0xe3   : > { %v523_v20 = vpop.f32.mrf.mxu1  ;;  %v435_v28 = vadd.f32 %v434_v19, %v2179_v31 }
  0xe4   : > { %v629_v25 = vmax.f32 %v561_v23, 0.0  ;;  %v524_v27 = vadd.f32 %v523_v20, %v2177_v3 }
  0xe5   : > { %1078 = vmatmul.bf16.gmra.mxu0 %v650_v15  ;;  %v598_v37 = vmax.f32 %v435_v28, 0.0 }
  0xe6   : > { %v2237_v26 = vpack.c.bf16 %v629_v25, %v627_v21  ;;  %v599_v33 = vmax.f32 %v524_v27, 0.0 }
  0xe9   : > { %v563_v30 = vpop.f32.mrf.mxu3 }
  0xea   : > { %v436_v22 = vpop.f32.mrf.mxu0  ;;  %v564_v41 = vadd.f32 %v563_v30, %v2177_v3  ;;  %v2255_v6 = vpop.f32.mrf.mxu2 }
  0xeb   : > { %v525_v32 = vpop.f32.mrf.mxu1  ;;  %v437_v34 = vadd.f32 %v436_v22, %v2179_v31 }
  0xec   : > { %v526_v35 = vadd.f32 %v525_v32, %v2177_v3  ;;  %v631_v48 = vmax.f32 %v564_v41, 0.0 }
  0xed   : > { %v600_v38 = vmax.f32 %v437_v34, 0.0 }
  0xee   : > { %v601_v40 = vmax.f32 %v526_v35, 0.0 }
  0xef   : > { %v652_v42 = vpack.c.bf16 %v600_v38, %v598_v37 }
  0xf0   : > { %v653_v18 = vpack.c.bf16 %v601_v40, %v599_v33 }
  0xf1   : > { %905 = vmatmul.bf16.gmra.mxu2 %v652_v42  ;;  %v565_v43 = vpop.f32.mrf.mxu3 }
  0xf2   : > { %994 = vmatmul.bf16.gmra.mxu3 %v653_v18  ;;  %1172 = vmatmul.bf16.gmra.mxu1 %v653_v18  ;;  %v439_v45 = vpop.f32.mrf.mxu0  ;;  %v566_v49 = vadd.f32 %v565_v43, %v2177_v3  ;;  %v2262_v21 = vpop.f32.mrf.mxu2 }
  0xf3   : > { %v528_v47 = vpop.f32.mrf.mxu1  ;;  %v440_v56 = vadd.f32 %v439_v45, %v2179_v31 }
  0xf4   : > { %v633_v52 = vmax.f32 %v566_v49, 0.0  ;;  %v529_v55 = vadd.f32 %v528_v47, %v2177_v3 }
  0xf5   : > { %1083 = vmatmul.bf16.gmra.mxu0 %v652_v42  ;;  %v602_v2 = vmax.f32 %v440_v56, 0.0 }
  0xf6   : > { %v2249_v54 = vpack.c.bf16 %v633_v52, %v631_v48  ;;  %v603_v60 = vmax.f32 %v529_v55, 0.0 }
  0xf9   : > { %v568_v57 = vpop.f32.mrf.mxu3 }
  0xfa   : > { %v441_v58 = vpop.f32.mrf.mxu0  ;;  %v569_v7 = vadd.f32 %v568_v57, %v2177_v3  ;;  %v2268_v42 = vpop.f32.mrf.mxu2  ;;  %v706_v57 = vld [vmem:[%s2575_s4] sm:$0x3] }
  0xfb   : > { %v530_v59 = vpop.f32.mrf.mxu1  ;;  %v442_v63 = vadd.f32 %v441_v58, %v2179_v31 }
  0xfc   : > { %v531_v0 = vadd.f32 %v530_v59, %v2177_v3  ;;  %v635_v15 = vmax.f32 %v569_v7, 0.0 }
  0xfd   : > { %v604_v4 = vmax.f32 %v442_v63, 0.0 }
  0xfe   : > { %v605_v5 = vmax.f32 %v531_v0, 0.0  ;;  %v2283_v0 = vperm.slane %v706_v57, 0 }
  0xff   : > { %v654_v8 = vpack.c.bf16 %v604_v4, %v602_v2 }
 0x100   : > { %v655_v9 = vpack.c.bf16 %v605_v5, %v603_v60 }
 0x101   : > { %910 = vmatmul.bf16.gmra.mxu2 %v654_v8  ;;  %v570_v10 = vpop.f32.mrf.mxu3 }
 0x102   : > { %999 = vmatmul.bf16.gmra.mxu3 %v655_v9  ;;  %1177 = vmatmul.bf16.gmra.mxu1 %v655_v9  ;;  %v444_v11 = vpop.f32.mrf.mxu0  ;;  %v571_v16 = vadd.f32 %v570_v10, %v2177_v3  ;;  %v2275_v56 = vpop.f32.mrf.mxu2 }
 0x103   : > { %v533_v13 = vpop.f32.mrf.mxu1  ;;  %v445_v23 = vadd.f32 %v444_v11, %v2179_v31  ;;  %v455_v11 = vadd.f32 %v2187_v39, %v2179_v31 }
 0x104   : > { %v637_v17 = vmax.f32 %v571_v16, 0.0  ;;  %v534_v20 = vadd.f32 %v533_v13, %v2177_v3  ;;  %v457_v13 = vadd.f32 %v2191_v51, %v2179_v31 }
 0x105   : > { %1088 = vmatmul.bf16.gmra.mxu0 %v654_v8  ;;  %v606_v33 = vmax.f32 %v445_v23, 0.0  ;;  %v1292_v8 = vld [vmem:[%s2576_s5] sm:$0x3] }
 0x106   : > { %v2259_v19 = vpack.c.bf16 %v637_v17, %v635_v15  ;;  %v607_v30 = vmax.f32 %v534_v20, 0.0  ;;  %v2295_v17 = vperm.slane %v1292_v8, 0  ;;  %v2297_v20 = vperm.slane %v1292_v8, 1 }
 0x109   : > { %v573_v25 = vpop.f32.mrf.mxu3 }
 0x10a   : > { %v446_v27 = vpop.f32.mrf.mxu0  ;;  %v574_v37 = vadd.f32 %v573_v25, %v2177_v3  ;;  %v614_v25 = vmax.f32 %v455_v11, 0.0 }
 0x10b   : > { %v535_v28 = vpop.f32.mrf.mxu1  ;;  %v447_v22 = vadd.f32 %v446_v27, %v2179_v31 }
 0x10c   : > { %v536_v32 = vadd.f32 %v535_v28, %v2177_v3  ;;  %v639_v43 = vmax.f32 %v574_v37, 0.0  ;;  %v616_v28 = vmax.f32 %v457_v13, 0.0 }
 0x10d   : > { %v608_v34 = vmax.f32 %v447_v22, 0.0 }
 0x10e   : > { %v609_v35 = vmax.f32 %v536_v32, 0.0 }
 0x10f   : > { %v656_v38 = vpack.c.bf16 %v608_v34, %v606_v33 }
 0x110   : > { %v657_v40 = vpack.c.bf16 %v609_v35, %v607_v30 }
 0x111   : > { %915 = vmatmul.bf16.gmra.mxu2 %v656_v38  ;;  %v575_v41 = vpop.f32.mrf.mxu3 }
 0x112   : > { %1004 = vmatmul.bf16.gmra.mxu3 %v657_v40  ;;  %1182 = vmatmul.bf16.gmra.mxu1 %v657_v40  ;;  %v449_v18 = vpop.f32.mrf.mxu0  ;;  %v576_v45 = vadd.f32 %v575_v41, %v2177_v3  ;;  %v2280_v3 = vperm.slane %v706_v57, 1  ;;  %v660_v41 = vpack.c.bf16 %v616_v28, %v614_v25 }
 0x113   : > { %v450_v49 = vadd.f32 %v449_v18, %v2179_v31 }
 0x114   : > { %v641_v47 = vmax.f32 %v576_v45, 0.0 }
 0x115   : > { %1093 = vmatmul.bf16.gmra.mxu0 %v656_v38  ;;  %v610_v58 = vmax.f32 %v450_v49, 0.0 }
 0x116   : > { %v2271_v48 = vpack.c.bf16 %v641_v47, %v639_v43 }
 0x11a   : > { %v451_v52 = vpop.f32.mrf.mxu0 }
 0x11b   : > { %v452_v55 = vadd.f32 %v451_v52, %v2179_v31 }
 0x11d   : > { %v612_v59 = vmax.f32 %v452_v55, 0.0 }
 0x11f   : > { %v1148_v60 = vpop.f32.mrf.mxu1  ;;  %v658_v63 = vpack.c.bf16 %v612_v59, %v610_v58 }
 0x121   : > { %920 = vmatmul.bf16.gmra.mxu2 %v658_v63 }
 0x122   : > { %1009 = vmatmul.bf16.gmra.mxu3 %v2193_v53  ;;  %1187 = vmatmul.bf16.gmra.mxu1 %v2193_v53  ;;  %v1059_v2 = vpop.f32.mrf.mxu0 }
 0x123   : > { %v1060_v4 = vadd.f32 %v1059_v2, %v2280_v3 }
 0x124   : > { %v881_v5 = vpop.f32.mrf.mxu2 }
 0x125   : > { %v970_v7 = vpop.f32.mrf.mxu3  ;;  %v1149_v9 = vadd.f32 %v1148_v60, %v1060_v4  ;;  %v882_v10 = vadd.f32 %v881_v5, %v2283_v0  ;;  %1098 = vmatmul.bf16.gmra.mxu0 %v658_v63  ;;  %v460_v60 = vadd.f32 %v2199_v1, %v2179_v31 }
 0x127   : > { %v1229_v53 = vmax.f32 %v1149_v9, 0.0  ;;  %v971_v15 = vadd.f32 %v970_v7, %v882_v10  ;;  %v1150_v16 = vpop.f32.mrf.mxu1  ;;  %v618_v7 = vmax.f32 %v460_v60, 0.0 }
 0x129   : > { %v1228_v23 = vmax.f32 %v971_v15, 0.0  ;;  %v1299_v39 = vmul.f32 %v2297_v20, %v1229_v53 }
 0x12a   : > { %v1061_v27 = vpop.f32.mrf.mxu0 }
 0x12b   : > { %v1062_v30 = vadd.f32 %v1061_v27, %v2280_v3  ;;  %v1298_v22 = vmul.f32 %v2295_v17, %v1228_v23 }
 0x12c   : > { %v883_v32 = vpop.f32.mrf.mxu2 }
 0x12d   : > { %v972_v33 = vpop.f32.mrf.mxu3  ;;  %v1151_v51 = vadd.f32 %v1150_v16, %v1062_v30  ;;  %v884_v34 = vadd.f32 %v883_v32, %v2283_v0  ;;  %v1362_v35 = vadd.f32 %v1299_v39, %v1298_v22 }
 0x12f   : > { %v1231_v37 = vmax.f32 %v1151_v51, 0.0  ;;  %v973_v38 = vadd.f32 %v972_v33, %v884_v34  ;;  %v1153_v40 = vpop.f32.mrf.mxu1  ;;  %1363 = vadd.xlane.f32.xlu0 %v1362_v35 }
 0x131   : > { %v1230_v18 = vmax.f32 %v973_v38, 0.0  ;;  %925 = vmatmul.bf16.gmra.mxu2 %v660_v41  ;;  %v1301_v49 = vmul.f32 %v2297_v20, %v1231_v37 }
 0x132   : > { %1014 = vmatmul.bf16.gmra.mxu3 %v2203_v12  ;;  %1192 = vmatmul.bf16.gmra.mxu1 %v2203_v12  ;;  %v1064_v43 = vpop.f32.mrf.mxu0  ;;  %v462_v12 = vadd.f32 %v2206_v14, %v2179_v31 }
 0x133   : > { %v1065_v45 = vadd.f32 %v1064_v43, %v2280_v3  ;;  %v1300_v47 = vmul.f32 %v2295_v17, %v1230_v18 }
 0x134   : > { %v886_v52 = vpop.f32.mrf.mxu2  ;;  %v620_v9 = vmax.f32 %v462_v12, 0.0 }
 0x135   : > { %v975_v55 = vpop.f32.mrf.mxu3  ;;  %v1154_v57 = vadd.f32 %v1153_v40, %v1065_v45  ;;  %v887_v58 = vadd.f32 %v886_v52, %v2283_v0  ;;  %1103 = vmatmul.bf16.gmra.mxu0 %v660_v41  ;;  %v1365_v59 = vadd.f32 %v1301_v49, %v1300_v47  ;;  %v465_v40 = vadd.f32 %v2212_v29, %v2179_v31 }
 0x136   : > { %v662_v28 = vpack.c.bf16 %v620_v9, %v618_v7 }
 0x137   : > { %v1233_v63 = vmax.f32 %v1154_v57, 0.0  ;;  %v976_v2 = vadd.f32 %v975_v55, %v887_v58  ;;  %v1155_v4 = vpop.f32.mrf.mxu1  ;;  %1366 = vadd.xlane.f32.xlu0 %v1365_v59  ;;  %v622_v47 = vmax.f32 %v465_v40, 0.0 }
 0x139   : > { %v1232_v5 = vmax.f32 %v976_v2, 0.0  ;;  %v1303_v13 = vmul.f32 %v2297_v20, %v1233_v63 }
 0x13a   : > { %v1066_v8 = vpop.f32.mrf.mxu0 }
 0x13b   : > { %v1067_v10 = vadd.f32 %v1066_v8, %v2280_v3  ;;  %v1302_v11 = vmul.f32 %v2295_v17, %v1232_v5 }
 0x13c   : > { %v888_v53 = vpop.f32.mrf.mxu2 }
 0x13d   : > { %v977_v15 = vpop.f32.mrf.mxu3  ;;  %v1156_v1 = vadd.f32 %v1155_v4, %v1067_v10  ;;  %v889_v16 = vadd.f32 %v888_v53, %v2283_v0  ;;  %v1368_v14 = vadd.f32 %v1303_v13, %v1302_v11 }
 0x13f   : > { %v1235_v23 = vmax.f32 %v1156_v1, 0.0  ;;  %v978_v25 = vadd.f32 %v977_v15, %v889_v16  ;;  %v1158_v27 = vpop.f32.mrf.mxu1  ;;  %1369 = vadd.xlane.f32.xlu1 %v1368_v14  ;;  %v470_v14 = vadd.f32 %v2225_v61, %v2179_v31 }
 0x141   : > { %v1234_v30 = vmax.f32 %v978_v25, 0.0  ;;  %930 = vmatmul.bf16.gmra.mxu2 %v662_v28  ;;  %v1305_v33 = vmul.f32 %v2297_v20, %v1235_v23 }
 0x142   : > { %1019 = vmatmul.bf16.gmra.mxu3 %v2215_v36  ;;  %1197 = vmatmul.bf16.gmra.mxu1 %v2215_v36  ;;  %v1069_v22 = vpop.f32.mrf.mxu0  ;;  %v467_v36 = vadd.f32 %v2221_v46, %v2179_v31 }
 0x143   : > { %v1070_v39 = vadd.f32 %v1069_v22, %v2280_v3  ;;  %v1304_v32 = vmul.f32 %v2295_v17, %v1234_v30  ;;  %v626_v30 = vmax.f32 %v470_v14, 0.0 }
 0x144   : > { %v891_v51 = vpop.f32.mrf.mxu2  ;;  %v624_v52 = vmax.f32 %v467_v36, 0.0 }
 0x145   : > { %v980_v34 = vpop.f32.mrf.mxu3  ;;  %v1159_v35 = vadd.f32 %v1158_v27, %v1070_v39  ;;  %v892_v37 = vadd.f32 %v891_v51, %v2283_v0  ;;  %1108 = vmatmul.bf16.gmra.mxu0 %v662_v28  ;;  %v1371_v38 = vadd.f32 %v1305_v33, %v1304_v32 }
 0x146   : > { %v664_v5 = vpack.c.bf16 %v624_v52, %v622_v47 }
 0x147   : > { %v1237_v41 = vmax.f32 %v1159_v35, 0.0  ;;  %v981_v18 = vadd.f32 %v980_v34, %v892_v37  ;;  %v1160_v43 = vpop.f32.mrf.mxu1  ;;  %1372 = vadd.xlane.f32.xlu1 %v1371_v38 }
 0x149   : > { %v1236_v45 = vmax.f32 %v981_v18, 0.0  ;;  %v1307_v58 = vmul.f32 %v2297_v20, %v1237_v41 }
 0x14a   : > { %v1071_v49 = vpop.f32.mrf.mxu0 }
 0x14b   : > { %v1072_v55 = vadd.f32 %v1071_v49, %v2280_v3  ;;  %v1306_v57 = vmul.f32 %v2295_v17, %v1236_v45 }
 0x14c   : > { %v893_v59 = vpop.f32.mrf.mxu2 }
 0x14d   : > { %v982_v60 = vpop.f32.mrf.mxu3  ;;  %v1161_v29 = vadd.f32 %v1160_v43, %v1072_v55  ;;  %v894_v12 = vadd.f32 %v893_v59, %v2283_v0  ;;  %v1374_v46 = vadd.f32 %v1307_v58, %v1306_v57 }
 0x14f   : > { %v1239_v63 = vmax.f32 %v1161_v29, 0.0  ;;  %v983_v2 = vadd.f32 %v982_v60, %v894_v12  ;;  %v1163_v4 = vpop.f32.mrf.mxu1  ;;  %1375 = vadd.xlane.f32.xlu2 %v1374_v46  ;;  %v475_v60 = vadd.f32 %v2241_v44, %v2179_v31 }
 0x151   : > { %v1238_v7 = vmax.f32 %v983_v2, 0.0  ;;  %935 = vmatmul.bf16.gmra.mxu2 %v664_v5  ;;  %v1309_v11 = vmul.f32 %v2297_v20, %v1239_v63  ;;  %v630_v2 = vmax.f32 %v475_v60, 0.0 }
 0x152   : > { %1024 = vmatmul.bf16.gmra.mxu3 %v2227_v62  ;;  %1202 = vmatmul.bf16.gmra.mxu1 %v2227_v62  ;;  %v1074_v8 = vpop.f32.mrf.mxu0  ;;  %v472_v62 = vadd.f32 %v2234_v24, %v2179_v31 }
 0x153   : > { %v1075_v9 = vadd.f32 %v1074_v8, %v2280_v3  ;;  %v1308_v10 = vmul.f32 %v2295_v17, %v1238_v7 }
 0x154   : > { %v896_v13 = vpop.f32.mrf.mxu2  ;;  %v628_v39 = vmax.f32 %v472_v62, 0.0 }
 0x155   : > { %v985_v53 = vpop.f32.mrf.mxu3  ;;  %v1164_v15 = vadd.f32 %v1163_v4, %v1075_v9  ;;  %v897_v1 = vadd.f32 %v896_v13, %v2283_v0  ;;  %1113 = vmatmul.bf16.gmra.mxu0 %v664_v5  ;;  %v1377_v16 = vadd.f32 %v1309_v11, %v1308_v10 }
 0x156   : > { %v666_v41 = vpack.c.bf16 %v628_v39, %v626_v30 }
 0x157   : > { %v1241_v23 = vmax.f32 %v1164_v15, 0.0  ;;  %v986_v25 = vadd.f32 %v985_v53, %v897_v1  ;;  %v1165_v27 = vpop.f32.mrf.mxu1  ;;  %1378 = vadd.xlane.f32.xlu2 %v1377_v16 }
 0x159   : > { %v1240_v28 = vmax.f32 %v986_v25, 0.0  ;;  %v1311_v51 = vmul.f32 %v2297_v20, %v1241_v23 }
 0x15a   : > { %v1076_v22 = vpop.f32.mrf.mxu0 }
 0x15b   : > { %v1310_v32 = vmul.f32 %v2295_v17, %v1240_v28  ;;  %v1077_v33 = vadd.f32 %v1076_v22, %v2280_v3 }
 0x15c   : > { %v898_v34 = vpop.f32.mrf.mxu2 }
 0x15d   : > { %v987_v35 = vpop.f32.mrf.mxu3  ;;  %v1166_v61 = vadd.f32 %v1165_v27, %v1077_v33  ;;  %v899_v37 = vadd.f32 %v898_v34, %v2283_v0  ;;  %v1380_v24 = vadd.f32 %v1311_v51, %v1310_v32  ;;  %v480_v33 = vadd.f32 %v2255_v6, %v2179_v31 }
 0x15f   : > { %v1243_v38 = vmax.f32 %v1166_v61, 0.0  ;;  %v988_v40 = vadd.f32 %v987_v35, %v899_v37  ;;  %v1168_v36 = vpop.f32.mrf.mxu1  ;;  %1381 = vadd.xlane.f32.xlu0 %v1380_v24  ;;  %v634_v37 = vmax.f32 %v480_v33, 0.0 }
 0x161   : > { %v1242_v18 = vmax.f32 %v988_v40, 0.0  ;;  %940 = vmatmul.bf16.gmra.mxu2 %v666_v41  ;;  %v1313_v49 = vmul.f32 %v2297_v20, %v1243_v38 }
 0x162   : > { %1029 = vmatmul.bf16.gmra.mxu3 %v2237_v26  ;;  %1207 = vmatmul.bf16.gmra.mxu1 %v2237_v26  ;;  %v1079_v43 = vpop.f32.mrf.mxu0  ;;  %v477_v26 = vadd.f32 %v2247_v50, %v2179_v31 }
 0x163   : > { %v1080_v45 = vadd.f32 %v1079_v43, %v2280_v3  ;;  %v1312_v47 = vmul.f32 %v2295_v17, %v1242_v18 }
 0x164   : > { %v901_v52 = vpop.f32.mrf.mxu2  ;;  %v632_v5 = vmax.f32 %v477_v26, 0.0 }
 0x165   : > { %v990_v55 = vpop.f32.mrf.mxu3  ;;  %v1169_v57 = vadd.f32 %v1168_v36, %v1080_v45  ;;  %v902_v58 = vadd.f32 %v901_v52, %v2283_v0  ;;  %1118 = vmatmul.bf16.gmra.mxu0 %v666_v41  ;;  %v1383_v59 = vadd.f32 %v1313_v49, %v1312_v47 }
 0x166   : > { %v668_v16 = vpack.c.bf16 %v632_v5, %v630_v2 }
 0x167   : > { %v1245_v29 = vmax.f32 %v1169_v57, 0.0  ;;  %v991_v12 = vadd.f32 %v990_v55, %v902_v58  ;;  %v1170_v46 = vpop.f32.mrf.mxu1  ;;  %1384 = vadd.xlane.f32.xlu1 %v1383_v59 }
 0x169   : > { %v1244_v63 = vmax.f32 %v991_v12, 0.0  ;;  %v1315_v9 = vmul.f32 %v2297_v20, %v1245_v29 }
 0x16a   : > { %v1081_v4 = vpop.f32.mrf.mxu0 }
 0x16b   : > { %v1314_v7 = vmul.f32 %v2295_v17, %v1244_v63  ;;  %v1082_v8 = vadd.f32 %v1081_v4, %v2280_v3  ;;  %v485_v4 = vadd.f32 %v2268_v42, %v2179_v31 }
 0x16c   : > { %v903_v10 = vpop.f32.mrf.mxu2 }
 0x16d   : > { %v992_v11 = vpop.f32.mrf.mxu3  ;;  %v1171_v44 = vadd.f32 %v1170_v46, %v1082_v8  ;;  %v904_v13 = vadd.f32 %v903_v10, %v2283_v0  ;;  %v1386_v50 = vadd.f32 %v1315_v9, %v1314_v7  ;;  %v638_v10 = vmax.f32 %v485_v4, 0.0 }
 0x16f   : > { %v1247_v53 = vmax.f32 %v1171_v44, 0.0  ;;  %v993_v15 = vadd.f32 %v992_v11, %v904_v13  ;;  %v1173_v1 = vpop.f32.mrf.mxu1  ;;  %1387 = vadd.xlane.f32.xlu2 %v1386_v50 }
 0x171   : > { %v1246_v14 = vmax.f32 %v993_v15, 0.0  ;;  %945 = vmatmul.bf16.gmra.mxu2 %v668_v16  ;;  %v1317_v27 = vmul.f32 %v2297_v20, %v1247_v53 }
 0x172   : > { %1034 = vmatmul.bf16.gmra.mxu3 %v2249_v54  ;;  %1212 = vmatmul.bf16.gmra.mxu1 %v2249_v54  ;;  %v1084_v62 = vpop.f32.mrf.mxu0  ;;  %v482_v54 = vadd.f32 %v2262_v21, %v2179_v31 }
 0x173   : > { %v1316_v23 = vmul.f32 %v2295_v17, %v1246_v14  ;;  %v1085_v25 = vadd.f32 %v1084_v62, %v2280_v3 }
 0x174   : > { %v906_v28 = vpop.f32.mrf.mxu2  ;;  %v636_v38 = vmax.f32 %v482_v54, 0.0 }
 0x175   : > { %v995_v30 = vpop.f32.mrf.mxu3  ;;  %v1174_v22 = vadd.f32 %v1173_v1, %v1085_v25  ;;  %v907_v39 = vadd.f32 %v906_v28, %v2283_v0  ;;  %1123 = vmatmul.bf16.gmra.mxu0 %v668_v16  ;;  %v1389_v32 = vadd.f32 %v1317_v27, %v1316_v23 }
 0x176   : > { %v670_v55 = vpack.c.bf16 %v636_v38, %v634_v37 }
 0x177   : > { %v1249_v51 = vmax.f32 %v1174_v22, 0.0  ;;  %v996_v34 = vadd.f32 %v995_v30, %v907_v39  ;;  %v1175_v35 = vpop.f32.mrf.mxu1  ;;  %1390 = vadd.xlane.f32.xlu0 %v1389_v32 }
 0x179   : > { %v1248_v61 = vmax.f32 %v996_v34, 0.0  ;;  %v1319_v41 = vmul.f32 %v2297_v20, %v1249_v51 }
 0x17a   : > { %v1086_v24 = vpop.f32.mrf.mxu0 }
 0x17b   : > { %v1318_v40 = vmul.f32 %v2295_v17, %v1248_v61  ;;  %v1087_v36 = vadd.f32 %v1086_v24, %v2280_v3 }
 0x17c   : > { %v908_v18 = vpop.f32.mrf.mxu2 }
 0x17d   : > { %v997_v43 = vpop.f32.mrf.mxu3  ;;  %v1176_v6 = vadd.f32 %v1175_v35, %v1087_v36  ;;  %v909_v45 = vadd.f32 %v908_v18, %v2283_v0  ;;  %v1392_v21 = vadd.f32 %v1319_v41, %v1318_v40 }
 0x17f   : > { %v1251_v47 = vmax.f32 %v1176_v6, 0.0  ;;  %v998_v49 = vadd.f32 %v997_v43, %v909_v45  ;;  %v1178_v52 = vpop.f32.mrf.mxu1  ;;  %1393 = vadd.xlane.f32.xlu1 %v1392_v21 }
 0x181   : > { %v1250_v57 = vmax.f32 %v998_v49, 0.0  ;;  %950 = vmatmul.bf16.gmra.mxu2 %v670_v55  ;;  %v1321_v26 = vmul.f32 %v2297_v20, %v1251_v47  ;;  %v2397_v49 = vld [vmem:[#allocation2] ss:$0 sm:$0xff] }
 0x182   : > { %1039 = vmatmul.bf16.gmra.mxu3 %v2259_v19  ;;  %1217 = vmatmul.bf16.gmra.mxu1 %v2259_v19  ;;  %v1089_v58 = vpop.f32.mrf.mxu0  ;;  %v487_v19 = vadd.f32 %v2275_v56, %v2179_v31 }
 0x183   : > { %v1320_v59 = vmul.f32 %v2295_v17, %v1250_v57  ;;  %v1090_v60 = vadd.f32 %v1089_v58, %v2280_v3 }
 0x184   : > { %v911_v29 = vpop.f32.mrf.mxu2  ;;  %v640_v44 = vmax.f32 %v487_v19, 0.0 }
 0x185   : > { %v1000_v12 = vpop.f32.mrf.mxu3  ;;  %v1179_v46 = vadd.f32 %v1178_v52, %v1090_v60  ;;  %v912_v63 = vadd.f32 %v911_v29, %v2283_v0  ;;  %1128 = vmatmul.bf16.gmra.mxu0 %v670_v55  ;;  %v1395_v2 = vadd.f32 %v1321_v26, %v1320_v59 }
 0x186   : > { %v672_v23 = vpack.c.bf16 %v640_v44, %v638_v10 }
 0x187   : > { %v1253_v5 = vmax.f32 %v1179_v46, 0.0  ;;  %v1001_v7 = vadd.f32 %v1000_v12, %v912_v63  ;;  %v1180_v8 = vpop.f32.mrf.mxu1  ;;  %1396 = vadd.xlane.f32.xlu2 %v1395_v2 }
 0x189   : > { %v1252_v9 = vmax.f32 %v1001_v7, 0.0  ;;  %v1323_v53 = vmul.f32 %v2297_v20, %v1253_v5 }
 0x18a   : > { %v1091_v11 = vpop.f32.mrf.mxu0 }
 0x18b   : > { %v1322_v13 = vmul.f32 %v2295_v17, %v1252_v9  ;;  %v1092_v50 = vadd.f32 %v1091_v11, %v2280_v3 }
 0x18c   : > { %v913_v15 = vpop.f32.mrf.mxu2 }
 0x18d   : > { %v1002_v1 = vpop.f32.mrf.mxu3  ;;  %v1181_v42 = vadd.f32 %v1180_v8, %v1092_v50  ;;  %v914_v16 = vadd.f32 %v913_v15, %v2283_v0  ;;  %v1398_v31 = vadd.f32 %v1323_v53, %v1322_v13 }
 0x18f   : > { %v1255_v56 = vmax.f32 %v1181_v42, 0.0  ;;  %v1003_v14 = vadd.f32 %v1002_v1, %v914_v16  ;;  %v1183_v62 = vpop.f32.mrf.mxu1  ;;  %1399 = vadd.xlane.f32.xlu0 %v1398_v31 }
 0x191   : > { %v1254_v25 = vmax.f32 %v1003_v14, 0.0  ;;  %955 = vmatmul.bf16.gmra.mxu2 %v672_v23  ;;  %v1325_v22 = vmul.f32 %v2297_v20, %v1255_v56 }
 0x192   : > { %1044 = vmatmul.bf16.gmra.mxu3 %v2271_v48  ;;  %1222 = vmatmul.bf16.gmra.mxu1 %v2271_v48  ;;  %v1094_v27 = vpop.f32.mrf.mxu0 }
 0x193   : > { %v1324_v28 = vmul.f32 %v2295_v17, %v1254_v25  ;;  %v1095_v30 = vadd.f32 %v1094_v27, %v2280_v3 }
 0x194   : > { %v916_v39 = vpop.f32.mrf.mxu2 }
 0x195   : > { %v1005_v32 = vpop.f32.mrf.mxu3  ;;  %v1184_v33 = vadd.f32 %v1183_v62, %v1095_v30  ;;  %v917_v54 = vadd.f32 %v916_v39, %v2283_v0  ;;  %v1401_v51 = vadd.f32 %v1325_v22, %v1324_v28 }
 0x197   : > { %v1257_v34 = vmax.f32 %v1184_v33, 0.0  ;;  %v1006_v35 = vadd.f32 %v1005_v32, %v917_v54  ;;  %v1185_v61 = vpop.f32.mrf.mxu1  ;;  %1402 = vadd.xlane.f32.xlu1 %v1401_v51 }
 0x199   : > { %v1256_v37 = vmax.f32 %v1006_v35, 0.0  ;;  %v1327_v40 = vmul.f32 %v2297_v20, %v1257_v34 }
 0x19a   : > { %v1096_v24 = vpop.f32.mrf.mxu0 }
 0x19b   : > { %v1326_v48 = vmul.f32 %v2295_v17, %v1256_v37  ;;  %v1097_v38 = vadd.f32 %v1096_v24, %v2280_v3 }
 0x19c   : > { %v918_v36 = vpop.f32.mrf.mxu2 }
 0x19d   : > { %v1007_v41 = vpop.f32.mrf.mxu3  ;;  %v1186_v18 = vadd.f32 %v1185_v61, %v1097_v38  ;;  %v919_v43 = vadd.f32 %v918_v36, %v2283_v0  ;;  %v1404_v6 = vadd.f32 %v1327_v40, %v1326_v48 }
 0x19f   : > { %v1259_v45 = vmax.f32 %v1186_v18, 0.0  ;;  %v1008_v21 = vadd.f32 %v1007_v41, %v919_v43  ;;  %v1188_v47 = vpop.f32.mrf.mxu1  ;;  %1405 = vadd.xlane.f32.xlu2 %v1404_v6 }
 0x1a1   : > { %v1258_v52 = vmax.f32 %v1008_v21, 0.0  ;;  %1133 = vmatmul.bf16.vlgmr.msra.gmra.mxu2 %v672_v23  ;;  %v1329_v26 = vmul.f32 %v2297_v20, %v1259_v45 }
 0x1a2   : > { %v1099_v55 = vpop.f32.mrf.mxu0  ;;  %v1364_v57 = vpop.xlane.xlu0 %1363 }
 0x1a3   : > { %v1328_v58 = vmul.f32 %v2295_v17, %v1258_v52  ;;  %v1100_v59 = vadd.f32 %v1099_v55, %v2280_v3  ;;  %v1462_v60 = vadd.f32 %v2397_v49, %v1364_v57 }
 0x1a4   : > { %v921_v29 = vpop.f32.mrf.mxu2 }
 0x1a5   : > { %v1010_v12 = vpop.f32.mrf.mxu3  ;;  %v1189_v46 = vadd.f32 %v1188_v47, %v1100_v59  ;;  %1495 = vst.msk [vmem:[%s2404_s9] sm:$0xff] %vm1494_vm1, %v1462_v60  ;;  %v922_v63 = vadd.f32 %v921_v29, %v2283_v0  ;;  %v1407_v2 = vadd.f32 %v1329_v26, %v1328_v58 }
 0x1a7   : > { %v1261_v4 = vmax.f32 %v1189_v46, 0.0  ;;  %v1011_v19 = vadd.f32 %v1010_v12, %v922_v63  ;;  %v1190_v5 = vpop.f32.mrf.mxu1  ;;  %1408 = vadd.xlane.f32.xlu0 %v1407_v2 }
 0x1a9   : > { %v1260_v7 = vmax.f32 %v1011_v19, 0.0  ;;  %v1331_v13 = vmul.f32 %v2297_v20, %v1261_v4 }
 0x1aa   : > { %v1101_v8 = vpop.f32.mrf.mxu0  ;;  %v1367_v9 = vpop.xlane.xlu0 %1366 }
 0x1ab   : > { %v1330_v10 = vmul.f32 %v2295_v17, %v1260_v7  ;;  %v1102_v11 = vadd.f32 %v1101_v8, %v2280_v3  ;;  %v1463_v44 = vadd.f32 %v2397_v49, %v1367_v9 }
 0x1ac   : > { %v923_v50 = vpop.f32.mrf.mxu2 }
 0x1ad   : > { %v1012_v53 = vpop.f32.mrf.mxu3  ;;  %v1191_v15 = vadd.f32 %v1190_v5, %v1102_v11  ;;  %1496 = vst.msk [vmem:[%s2404_s9 + $0x8] sm:$0xff] %vm1494_vm1, %v1463_v44  ;;  %v924_v1 = vadd.f32 %v923_v50, %v2283_v0  ;;  %v1410_v42 = vadd.f32 %v1331_v13, %v1330_v10 }
 0x1af   : > { %v1263_v16 = vmax.f32 %v1191_v15, 0.0  ;;  %v1013_v31 = vadd.f32 %v1012_v53, %v924_v1  ;;  %v1193_v56 = vpop.f32.mrf.mxu1  ;;  %1411 = vadd.xlane.f32.xlu1 %v1410_v42 }
 0x1b1   : > { %v1262_v14 = vmax.f32 %v1013_v31, 0.0  ;;  %v1333_v30 = vmul.f32 %v2297_v20, %v1263_v16 }
 0x1b2   : > { %v1104_v62 = vpop.f32.mrf.mxu0  ;;  %v1370_v23 = vpop.xlane.xlu1 %1369 }
 0x1b3   : > { %v1332_v25 = vmul.f32 %v2295_v17, %v1262_v14  ;;  %v1105_v27 = vadd.f32 %v1104_v62, %v2280_v3  ;;  %v1464_v28 = vadd.f32 %v2397_v49, %v1370_v23 }
 0x1b4   : > { %v926_v22 = vpop.f32.mrf.mxu2 }
 0x1b5   : > { %v1015_v39 = vpop.f32.mrf.mxu3  ;;  %v1194_v32 = vadd.f32 %v1193_v56, %v1105_v27  ;;  %1497 = vst.msk [vmem:[%s2404_s9 + $0x10] sm:$0xff] %vm1494_vm1, %v1464_v28  ;;  %v927_v33 = vadd.f32 %v926_v22, %v2283_v0  ;;  %v1413_v54 = vadd.f32 %v1333_v30, %v1332_v25 }
 0x1b7   : > { %v1265_v51 = vmax.f32 %v1194_v32, 0.0  ;;  %v1016_v34 = vadd.f32 %v1015_v39, %v927_v33  ;;  %v1195_v35 = vpop.f32.mrf.mxu1  ;;  %1414 = vadd.xlane.f32.xlu2 %v1413_v54 }
 0x1b9   : > { %v1264_v61 = vmax.f32 %v1016_v34, 0.0  ;;  %v1335_v36 = vmul.f32 %v2297_v20, %v1265_v51 }
 0x1ba   : > { %v1106_v37 = vpop.f32.mrf.mxu0  ;;  %v1373_v24 = vpop.xlane.xlu1 %1372 }
 0x1bb   : > { %v1334_v48 = vmul.f32 %v2295_v17, %v1264_v61  ;;  %v1107_v38 = vadd.f32 %v1106_v37, %v2280_v3  ;;  %v1465_v40 = vadd.f32 %v2397_v49, %v1373_v24 }
 0x1bc   : > { %v928_v41 = vpop.f32.mrf.mxu2 }
 0x1bd   : > { %v1017_v18 = vpop.f32.mrf.mxu3  ;;  %v1196_v43 = vadd.f32 %v1195_v35, %v1107_v38  ;;  %1498 = vst.msk [vmem:[%s2404_s9 + $0x18] sm:$0xff] %vm1494_vm1, %v1465_v40  ;;  %v929_v6 = vadd.f32 %v928_v41, %v2283_v0  ;;  %v1416_v45 = vadd.f32 %v1335_v36, %v1334_v48 }
 0x1bf   : > { %v1267_v21 = vmax.f32 %v1196_v43, 0.0  ;;  %v1018_v47 = vadd.f32 %v1017_v18, %v929_v6  ;;  %v1198_v52 = vpop.f32.mrf.mxu1  ;;  %1417 = vadd.xlane.f32.xlu0 %v1416_v45 }
 0x1c1   : > { %v1266_v55 = vmax.f32 %v1018_v47, 0.0  ;;  %v1337_v29 = vmul.f32 %v2297_v20, %v1267_v21 }
 0x1c2   : > { %v1109_v57 = vpop.f32.mrf.mxu0  ;;  %v1376_v58 = vpop.xlane.xlu2 %1375 }
 0x1c3   : > { %v1336_v59 = vmul.f32 %v2295_v17, %v1266_v55  ;;  %v1110_v60 = vadd.f32 %v1109_v57, %v2280_v3  ;;  %v1466_v26 = vadd.f32 %v2397_v49, %v1376_v58 }
 0x1c4   : > { %v931_v12 = vpop.f32.mrf.mxu2 }
 0x1c5   : > { %v1020_v46 = vpop.f32.mrf.mxu3  ;;  %v1199_v63 = vadd.f32 %v1198_v52, %v1110_v60  ;;  %1499 = vst.msk [vmem:[%s2404_s9 + $0x20] sm:$0xff] %vm1494_vm1, %v1466_v26  ;;  %v932_v2 = vadd.f32 %v931_v12, %v2283_v0  ;;  %v1419_v4 = vadd.f32 %v1337_v29, %v1336_v59 }
 0x1c7   : > { %v1269_v19 = vmax.f32 %v1199_v63, 0.0  ;;  %v1021_v5 = vadd.f32 %v1020_v46, %v932_v2  ;;  %v1200_v7 = vpop.f32.mrf.mxu1  ;;  %1420 = vadd.xlane.f32.xlu1 %v1419_v4 }
 0x1c9   : > { %v1268_v8 = vmax.f32 %v1021_v5, 0.0  ;;  %v1339_v50 = vmul.f32 %v2297_v20, %v1269_v19 }
 0x1ca   : > { %v1111_v9 = vpop.f32.mrf.mxu0  ;;  %v1379_v10 = vpop.xlane.xlu2 %1378 }
 0x1cb   : > { %v1338_v11 = vmul.f32 %v2295_v17, %v1268_v8  ;;  %v1112_v44 = vadd.f32 %v1111_v9, %v2280_v3  ;;  %v1467_v13 = vadd.f32 %v2397_v49, %v1379_v10 }
 0x1cc   : > { %v933_v53 = vpop.f32.mrf.mxu2 }
 0x1cd   : > { %v1022_v15 = vpop.f32.mrf.mxu3  ;;  %v1201_v1 = vadd.f32 %v1200_v7, %v1112_v44  ;;  %1500 = vst.msk [vmem:[%s2404_s9 + $0x28] sm:$0xff] %vm1494_vm1, %v1467_v13  ;;  %v934_v42 = vadd.f32 %v933_v53, %v2283_v0  ;;  %v1422_v16 = vadd.f32 %v1339_v50, %v1338_v11 }
 0x1cf   : > { %v1271_v31 = vmax.f32 %v1201_v1, 0.0  ;;  %v1023_v56 = vadd.f32 %v1022_v15, %v934_v42  ;;  %v1203_v14 = vpop.f32.mrf.mxu1  ;;  %1423 = vadd.xlane.f32.xlu2 %v1422_v16 }
 0x1d1   : > { %v1270_v62 = vmax.f32 %v1023_v56, 0.0  ;;  %v1341_v22 = vmul.f32 %v2297_v20, %v1271_v31 }
 0x1d2   : > { %v1114_v23 = vpop.f32.mrf.mxu0  ;;  %v1382_v25 = vpop.xlane.xlu0 %1381 }
 0x1d3   : > { %v1340_v27 = vmul.f32 %v2295_v17, %v1270_v62  ;;  %v1115_v28 = vadd.f32 %v1114_v23, %v2280_v3  ;;  %v1468_v30 = vadd.f32 %v2397_v49, %v1382_v25 }
 0x1d4   : > { %v936_v39 = vpop.f32.mrf.mxu2 }
 0x1d5   : > { %v1025_v32 = vpop.f32.mrf.mxu3  ;;  %v1204_v33 = vadd.f32 %v1203_v14, %v1115_v28  ;;  %1501 = vst.msk [vmem:[%s2404_s9 + $0x30] sm:$0xff] %vm1494_vm1, %v1468_v30  ;;  %v937_v54 = vadd.f32 %v936_v39, %v2283_v0  ;;  %v1425_v51 = vadd.f32 %v1341_v22, %v1340_v27 }
 0x1d7   : > { %v1273_v34 = vmax.f32 %v1204_v33, 0.0  ;;  %v1026_v35 = vadd.f32 %v1025_v32, %v937_v54  ;;  %v1205_v61 = vpop.f32.mrf.mxu1  ;;  %1426 = vadd.xlane.f32.xlu0 %v1425_v51 }
 0x1d9   : > { %v1272_v37 = vmax.f32 %v1026_v35, 0.0  ;;  %v1343_v41 = vmul.f32 %v2297_v20, %v1273_v34 }
 0x1da   : > { %v1116_v24 = vpop.f32.mrf.mxu0  ;;  %v1385_v48 = vpop.xlane.xlu1 %1384 }
 0x1db   : > { %v1342_v38 = vmul.f32 %v2295_v17, %v1272_v37  ;;  %v1117_v40 = vadd.f32 %v1116_v24, %v2280_v3  ;;  %v1469_v36 = vadd.f32 %v2397_v49, %v1385_v48 }
 0x1dc   : > { %v938_v18 = vpop.f32.mrf.mxu2 }
 0x1dd   : > { %v1027_v43 = vpop.f32.mrf.mxu3  ;;  %v1206_v6 = vadd.f32 %v1205_v61, %v1117_v40  ;;  %1502 = vst.msk [vmem:[%s2404_s9 + $0x38] sm:$0xff] %vm1494_vm1, %v1469_v36  ;;  %v939_v45 = vadd.f32 %v938_v18, %v2283_v0  ;;  %v1428_v21 = vadd.f32 %v1343_v41, %v1342_v38 }
 0x1df   : > { %v1275_v47 = vmax.f32 %v1206_v6, 0.0  ;;  %v1028_v52 = vadd.f32 %v1027_v43, %v939_v45  ;;  %v1208_v55 = vpop.f32.mrf.mxu1  ;;  %1429 = vadd.xlane.f32.xlu1 %v1428_v21 }
 0x1e1   : > { %v1274_v57 = vmax.f32 %v1028_v52, 0.0  ;;  %v1345_v12 = vmul.f32 %v2297_v20, %v1275_v47 }
 0x1e2   : > { %v1119_v58 = vpop.f32.mrf.mxu0  ;;  %v1388_v59 = vpop.xlane.xlu2 %1387 }
 0x1e3   : > { %v1344_v60 = vmul.f32 %v2295_v17, %v1274_v57  ;;  %v1120_v26 = vadd.f32 %v1119_v58, %v2280_v3  ;;  %v1470_v29 = vadd.f32 %v2397_v49, %v1388_v59 }
 0x1e4   : > { %v941_v46 = vpop.f32.mrf.mxu2 }
 0x1e5   : > { %v1030_v63 = vpop.f32.mrf.mxu3  ;;  %v1209_v2 = vadd.f32 %v1208_v55, %v1120_v26  ;;  %1503 = vst.msk [vmem:[%s2404_s9 + $0x40] sm:$0xff] %vm1494_vm1, %v1470_v29  ;;  %v942_v4 = vadd.f32 %v941_v46, %v2283_v0  ;;  %v1431_v19 = vadd.f32 %v1345_v12, %v1344_v60 }
 0x1e7   : > { %v1277_v5 = vmax.f32 %v1209_v2, 0.0  ;;  %v1031_v7 = vadd.f32 %v1030_v63, %v942_v4  ;;  %v1210_v8 = vpop.f32.mrf.mxu1  ;;  %1432 = vadd.xlane.f32.xlu2 %v1431_v19 }
 0x1e9   : > { %v1276_v9 = vmax.f32 %v1031_v7, 0.0  ;;  %v1347_v53 = vmul.f32 %v2297_v20, %v1277_v5 }
 0x1ea   : > { %v1121_v10 = vpop.f32.mrf.mxu0  ;;  %v1391_v11 = vpop.xlane.xlu0 %1390 }
 0x1eb   : > { %v1346_v44 = vmul.f32 %v2295_v17, %v1276_v9  ;;  %v1122_v13 = vadd.f32 %v1121_v10, %v2280_v3  ;;  %v1471_v50 = vadd.f32 %v2397_v49, %v1391_v11 }
 0x1ec   : > { %v943_v15 = vpop.f32.mrf.mxu2 }
 0x1ed   : > { %v1032_v1 = vpop.f32.mrf.mxu3  ;;  %v1211_v42 = vadd.f32 %v1210_v8, %v1122_v13  ;;  %1504 = vst.msk [vmem:[%s2404_s9 + $0x48] sm:$0xff] %vm1494_vm1, %v1471_v50  ;;  %v944_v16 = vadd.f32 %v943_v15, %v2283_v0  ;;  %v1434_v31 = vadd.f32 %v1347_v53, %v1346_v44 }
 0x1ef   : > { %v1279_v56 = vmax.f32 %v1211_v42, 0.0  ;;  %v1033_v14 = vadd.f32 %v1032_v1, %v944_v16  ;;  %v1213_v62 = vpop.f32.mrf.mxu1  ;;  %1435 = vadd.xlane.f32.xlu0 %v1434_v31 }
 0x1f1   : > { %v1278_v23 = vmax.f32 %v1033_v14, 0.0  ;;  %v1349_v39 = vmul.f32 %v2297_v20, %v1279_v56 }
 0x1f2   : > { %v1124_v25 = vpop.f32.mrf.mxu0  ;;  %v1394_v27 = vpop.xlane.xlu1 %1393 }
 0x1f3   : > { %v1348_v28 = vmul.f32 %v2295_v17, %v1278_v23  ;;  %v1125_v30 = vadd.f32 %v1124_v25, %v2280_v3  ;;  %v1472_v22 = vadd.f32 %v2397_v49, %v1394_v27 }
 0x1f4   : > { %v946_v32 = vpop.f32.mrf.mxu2 }
 0x1f5   : > { %v1035_v33 = vpop.f32.mrf.mxu3  ;;  %v1214_v54 = vadd.f32 %v1213_v62, %v1125_v30  ;;  %1505 = vst.msk [vmem:[%s2404_s9 + $0x50] sm:$0xff] %vm1494_vm1, %v1472_v22  ;;  %v947_v51 = vadd.f32 %v946_v32, %v2283_v0  ;;  %v1437_v34 = vadd.f32 %v1349_v39, %v1348_v28 }
 0x1f7   : > { %v1281_v35 = vmax.f32 %v1214_v54, 0.0  ;;  %v1036_v61 = vadd.f32 %v1035_v33, %v947_v51  ;;  %v1215_v37 = vpop.f32.mrf.mxu1  ;;  %1438 = vadd.xlane.f32.xlu1 %v1437_v34 }
 0x1f9   : > { %v1280_v24 = vmax.f32 %v1036_v61, 0.0  ;;  %v1351_v18 = vmul.f32 %v2297_v20, %v1281_v35 }
 0x1fa   : > { %v1126_v48 = vpop.f32.mrf.mxu0  ;;  %v1397_v38 = vpop.xlane.xlu2 %1396 }
 0x1fb   : > { %v1350_v40 = vmul.f32 %v2295_v17, %v1280_v24  ;;  %v1127_v36 = vadd.f32 %v1126_v48, %v2280_v3  ;;  %v1473_v41 = vadd.f32 %v2397_v49, %v1397_v38 }
 0x1fc   : > { %v948_v43 = vpop.f32.mrf.mxu2 }
 0x1fd   : > { %v1037_v6 = vpop.f32.mrf.mxu3  ;;  %v1216_v45 = vadd.f32 %v1215_v37, %v1127_v36  ;;  %1506 = vst.msk [vmem:[%s2404_s9 + $0x58] sm:$0xff] %vm1494_vm1, %v1473_v41  ;;  %v949_v21 = vadd.f32 %v948_v43, %v2283_v0  ;;  %v1440_v47 = vadd.f32 %v1351_v18, %v1350_v40 }
 0x1ff   : > { %v1283_v52 = vmax.f32 %v1216_v45, 0.0  ;;  %v1038_v55 = vadd.f32 %v1037_v6, %v949_v21  ;;  %1441 = vadd.xlane.f32.xlu2 %v1440_v47  ;;  %v1218_v58 = vpop.f32.mrf.mxu1 }
 0x201   : > { %v1282_v57 = vmax.f32 %v1038_v55, 0.0  ;;  %v1353_v46 = vmul.f32 %v2297_v20, %v1283_v52 }
 0x202   : > { %v1129_v59 = vpop.f32.mrf.mxu0  ;;  %v1400_v60 = vpop.xlane.xlu0 %1399 }
 0x203   : > { %v1352_v26 = vmul.f32 %v2295_v17, %v1282_v57  ;;  %v1130_v29 = vadd.f32 %v1129_v59, %v2280_v3  ;;  %v1474_v12 = vadd.f32 %v2397_v49, %v1400_v60 }
 0x204   : > { %v951_v63 = vpop.f32.mrf.mxu2 }
 0x205   : > { %v1040_v2 = vpop.f32.mrf.mxu3  ;;  %v1219_v4 = vadd.f32 %v1218_v58, %v1130_v29  ;;  %1507 = vst.msk [vmem:[%s2404_s9 + $0x60] sm:$0xff] %vm1494_vm1, %v1474_v12  ;;  %v952_v19 = vadd.f32 %v951_v63, %v2283_v0  ;;  %v1443_v5 = vadd.f32 %v1353_v46, %v1352_v26 }
 0x207   : > { %v1285_v7 = vmax.f32 %v1219_v4, 0.0  ;;  %v1041_v8 = vadd.f32 %v1040_v2, %v952_v19  ;;  %1444 = vadd.xlane.f32.xlu0 %v1443_v5  ;;  %v1220_v15 = vpop.f32.mrf.mxu1 }
 0x209   : > { %v1284_v9 = vmax.f32 %v1041_v8, 0.0  ;;  %v1355_v53 = vmul.f32 %v2297_v20, %v1285_v7 }
 0x20a   : > { %v1131_v10 = vpop.f32.mrf.mxu0  ;;  %v1403_v11 = vpop.xlane.xlu1 %1402 }
 0x20b   : > { %v1354_v44 = vmul.f32 %v2295_v17, %v1284_v9  ;;  %v1132_v13 = vadd.f32 %v1131_v10, %v2280_v3  ;;  %v1475_v50 = vadd.f32 %v2397_v49, %v1403_v11 }
 0x20c   : > { %v953_v1 = vpop.f32.mrf.mxu2 }
 0x20d   : > { %v1221_v42 = vadd.f32 %v1220_v15, %v1132_v13  ;;  %1508 = vst.msk [vmem:[%s2404_s9 + $0x68] sm:$0xff] %vm1494_vm1, %v1475_v50  ;;  %v954_v16 = vadd.f32 %v953_v1, %v2283_v0  ;;  %v1446_v31 = vadd.f32 %v1355_v53, %v1354_v44  ;;  %v1042_v56 = vpop.f32.mrf.mxu3 }
 0x20f   : > { %v1287_v14 = vmax.f32 %v1221_v42, 0.0  ;;  %v1043_v62 = vadd.f32 %v1042_v56, %v954_v16  ;;  %1447 = vadd.xlane.f32.xlu1 %v1446_v31  ;;  %v1223_v24 = vpop.f32.mrf.mxu1 }
 0x211   : > { %v1286_v23 = vmax.f32 %v1043_v62, 0.0  ;;  %v1357_v30 = vmul.f32 %v2297_v20, %v1287_v14 }
 0x212   : > { %v1406_v25 = vpop.xlane.xlu2 %1405 }
 0x213   : > { %v1356_v27 = vmul.f32 %v2295_v17, %v1286_v23  ;;  %v1476_v28 = vadd.f32 %v2397_v49, %v1406_v25 }
 0x214   : > { %v956_v22 = vpop.f32.mrf.mxu2 }
 0x215   : > { %1509 = vst.msk [vmem:[%s2404_s9 + $0x70] sm:$0xff] %vm1494_vm1, %v1476_v28  ;;  %v1449_v39 = vadd.f32 %v1357_v30, %v1356_v27  ;;  %v957_v51 = vadd.f32 %v956_v22, %v2283_v0  ;;  %v1045_v34 = vpop.f32.mrf.mxu3 }
 0x217   : > { %1450 = vadd.xlane.f32.xlu2 %v1449_v39  ;;  %v1046_v61 = vadd.f32 %v1045_v34, %v957_v51 }
 0x219   : > { %v1288_v40 = vmax.f32 %v1046_v61, 0.0 }
 0x21a   : > { %v1409_v32 = vpop.xlane.xlu0 %1408 }
 0x21b   : > { %v1477_v33 = vadd.f32 %v2397_v49, %v1409_v32  ;;  %v1358_v45 = vmul.f32 %v2295_v17, %v1288_v40 }
 0x21c   : > { %v958_v54 = vpop.f32.mrf.mxu2 }
 0x21d   : > { %1510 = vst.msk [vmem:[%s2404_s9 + $0x78] sm:$0xff] %vm1494_vm1, %v1477_v33  ;;  %v959_v36 = vadd.f32 %v958_v54, %v2283_v0  ;;  %v1047_v43 = vpop.f32.mrf.mxu3  ;;  %v1225_v0 = vpop.f32.mrf.mxu1 }
 0x21f   : > { %v1048_v21 = vadd.f32 %v1047_v43, %v959_v36 }
 0x221   : > { %v1290_v59 = vmax.f32 %v1048_v21, 0.0 }
 0x222   : > { %v1412_v35 = vpop.xlane.xlu1 %1411 }
 0x223   : > { %v1478_v37 = vadd.f32 %v2397_v49, %v1412_v35  ;;  %v1360_v12 = vmul.f32 %v2295_v17, %v1290_v59 }
 0x224   : > { %v1134_v48 = vpop.f32.mrf.mxu2 }
 0x225   : > { %1511 = vst.msk [vmem:[%s2404_s9 + $0x80] sm:$0xff] %vm1494_vm1, %v1478_v37  ;;  %v1135_v38 = vadd.f32 %v1134_v48, %v2280_v3 }
 0x227   : > { %v1224_v41 = vadd.f32 %v1223_v24, %v1135_v38 }
 0x229   : > { %v1289_v18 = vmax.f32 %v1224_v41, 0.0 }
 0x22a   : > { %v1415_v6 = vpop.xlane.xlu2 %1414 }
 0x22b   : > { %v1479_v47 = vadd.f32 %v2397_v49, %v1415_v6  ;;  %v1359_v52 = vmul.f32 %v2297_v20, %v1289_v18 }
 0x22c   : > { %v1136_v55 = vpop.f32.mrf.mxu2 }
 0x22d   : > { %1512 = vst.msk [vmem:[%s2404_s9 + $0x88] sm:$0xff] %vm1494_vm1, %v1479_v47  ;;  %v1137_v57 = vadd.f32 %v1136_v55, %v2280_v3  ;;  %v1452_v58 = vadd.f32 %v1359_v52, %v1358_v45 }
 0x22f   : > { %v1226_v60 = vadd.f32 %v1225_v0, %v1137_v57  ;;  %1453 = vadd.xlane.f32.xlu0 %v1452_v58 }
 0x231   : > { %v1291_v26 = vmax.f32 %v1226_v60, 0.0 }
 0x232   : > { %v1418_v29 = vpop.xlane.xlu0 %1417 }
 0x233   : > { %v1480_v46 = vadd.f32 %v2397_v49, %v1418_v29  ;;  %v1361_v63 = vmul.f32 %v2297_v20, %v1291_v26 }
 0x235   : > { %1513 = vst.msk [vmem:[%s2404_s9 + $0x90] sm:$0xff] %vm1494_vm1, %v1480_v46  ;;  %v1455_v3 = vadd.f32 %v1361_v63, %v1360_v12 }
 0x237   : > { %1456 = vadd.xlane.f32.xlu1 %v1455_v3 }
 0x23a   : > { %v1421_v2 = vpop.xlane.xlu1 %1420 }
 0x23b   : > { %v1481_v4 = vadd.f32 %v2397_v49, %v1421_v2 }
 0x23d   : > { %1514 = vst.msk [vmem:[%s2404_s9 + $0x98] sm:$0xff] %vm1494_vm1, %v1481_v4 }
 0x242   : > { %v1424_v19 = vpop.xlane.xlu2 %1423 }
 0x243   : > { %v1482_v5 = vadd.f32 %v2397_v49, %v1424_v19 }
 0x245   : > { %1515 = vst.msk [vmem:[%s2404_s9 + $0xa0] sm:$0xff] %vm1494_vm1, %v1482_v5 }
 0x24a   : > { %v1427_v17 = vpop.xlane.xlu0 %1426 }
 0x24b   : > { %v1483_v20 = vadd.f32 %v2397_v49, %v1427_v17 }
 0x24d   : > { %1516 = vst.msk [vmem:[%s2404_s9 + $0xa8] sm:$0xff] %vm1494_vm1, %v1483_v20 }
 0x252   : > { %v1430_v7 = vpop.xlane.xlu1 %1429 }
 0x253   : > { %v1484_v8 = vadd.f32 %v2397_v49, %v1430_v7 }
 0x255   : > { %1517 = vst.msk [vmem:[%s2404_s9 + $0xb0] sm:$0xff] %vm1494_vm1, %v1484_v8 }
 0x25a   : > { %v1433_v9 = vpop.xlane.xlu2 %1432 }
 0x25b   : > { %v1485_v10 = vadd.f32 %v2397_v49, %v1433_v9 }
 0x25d   : > { %1518 = vst.msk [vmem:[%s2404_s9 + $0xb8] sm:$0xff] %vm1494_vm1, %v1485_v10 }
 0x262   : > { %v1436_v11 = vpop.xlane.xlu0 %1435 }
 0x263   : > { %v1486_v44 = vadd.f32 %v2397_v49, %v1436_v11 }
 0x265   : > { %1519 = vst.msk [vmem:[%s2404_s9 + $0xc0] sm:$0xff] %vm1494_vm1, %v1486_v44 }
 0x26a   : > { %v1439_v13 = vpop.xlane.xlu1 %1438 }
 0x26b   : > { %v1487_v50 = vadd.f32 %v2397_v49, %v1439_v13 }
 0x26d   : > { %1520 = vst.msk [vmem:[%s2404_s9 + $0xc8] sm:$0xff] %vm1494_vm1, %v1487_v50 }
 0x272   : > { %v1442_v53 = vpop.xlane.xlu2 %1441 }
 0x273   : > { %v1488_v15 = vadd.f32 %v2397_v49, %v1442_v53 }
 0x275   : > { %1521 = vst.msk [vmem:[%s2404_s9 + $0xd0] sm:$0xff] %vm1494_vm1, %v1488_v15 }
 0x27a   : > { %v1445_v1 = vpop.xlane.xlu0 %1444 }
 0x27b   : > { %v1489_v42 = vadd.f32 %v2397_v49, %v1445_v1 }
 0x27d   : > { %1522 = vst.msk [vmem:[%s2404_s9 + $0xd8] sm:$0xff] %vm1494_vm1, %v1489_v42 }
 0x282   : > { %v1448_v16 = vpop.xlane.xlu1 %1447 }
 0x283   : > { %v1490_v31 = vadd.f32 %v2397_v49, %v1448_v16 }
 0x285   : > { %1523 = vst.msk [vmem:[%s2404_s9 + $0xe0] sm:$0xff] %vm1494_vm1, %v1490_v31 }
 0x28a   : > { %v1451_v56 = vpop.xlane.xlu2 %1450 }
 0x28b   : > { %v1491_v14 = vadd.f32 %v2397_v49, %v1451_v56 }
 0x28d   : > { %1524 = vst.msk [vmem:[%s2404_s9 + $0xe8] sm:$0xff] %vm1494_vm1, %v1491_v14 }
 0x2a2   : > { %v1454_v62 = vpop.xlane.xlu0 %1453 }
 0x2a3   : > { %v1492_v23 = vadd.f32 %v2397_v49, %v1454_v62 }
 0x2a5   : > { %1525 = vst.msk [vmem:[%s2404_s9 + $0xf0] sm:$0xff] %vm1494_vm1, %v1492_v23 }
 0x2aa   : > { %v1457_v25 = vpop.xlane.xlu1 %1456 }
 0x2ab   : > { %v1493_v27 = vadd.f32 %v2397_v49, %v1457_v25 }
 0x2ad   : > { %1526 = vst.msk [vmem:[%s2404_s9 + $0xf8] sm:$0xff] %vm1494_vm1, %v1493_v27 }
 0x2ae PF: > { %s19_s26 = sadd.s32 1, %s1821_s26  }
 0x2af   : > { %p16_p4 = scmp.ge.s32.totalorder %s19_s26, 4  }
 0x2b1   :  { %18 = sbr.rel (!%p16_p4) target bundleno = 3 (0x3), region = 78 }

</bundles_post_ra>
